<compile_context>
chip_gen: v7x
topology: tpu7x:2x2x1
jax: 0.10.0
libtpu: 0.0.40
codegen_flags: <defaults>
</compile_context>

<pallas_src>
import functools

import jax
import jax.numpy as jnp
from jax.experimental import pallas as pl
from jax.experimental.pallas import tpu as pltpu


def _layer_norm(x, g, b, eps=1e-5):
    # One-pass variance (E[x^2] - mu^2): one fewer full-slab pass than
    # mean((x - mu)^2); fine at f32 for these magnitudes.
    mu = jnp.mean(x, axis=-1, keepdims=True)
    ms = jnp.mean(x * x, axis=-1, keepdims=True)
    var = ms - mu * mu
    return (x - mu) * jax.lax.rsqrt(var + eps) * g + b


def gcl_kernel(hs_ref,
               w_ff1_ref, b_ff1_ref, w_ff2_ref, b_ff2_ref,
               ln1_g_ref, ln1_b_ref,
               w_qkv_ref, b_qkv_ref, w_c_ref,
               w_gate_ref, b_gate_ref, w_cgate_ref,
               ln2_g_ref, ln2_b_ref, ln3_g_ref, ln3_b_ref,
               out_ref, scores_ref, *, matmul_dtype=jnp.float32):
    hs3 = hs_ref[...].astype(jnp.float32)          # [Bt, S, H] original input slab
    Bt, S, H = hs3.shape
    hs2 = hs3.reshape(Bt * S, H)                   # flatten batch*seq -> MXU-shaped M
    inv_sqrt_h = 1.0 / float(H) ** 0.5             # compile-time constant

    def mm(a, b):
        # MXU matmul; operands cast to matmul_dtype (f32 default for 1e-4
        # tolerance, bf16 for peak v6e/v7x throughput), f32 accumulation.
        return jnp.dot(a.astype(matmul_dtype), b.astype(matmul_dtype),
                       preferred_element_type=jnp.float32)

    # ---- global context vector: mean over seq -> Linear/ReLU/Linear
    cv = jnp.mean(hs3, axis=1)                                                    # [Bt, H]
    cv = jnp.maximum(mm(cv, w_ff1_ref[...]) + b_ff1_ref[...], 0.0)
    cv = mm(cv, w_ff2_ref[...]) + b_ff2_ref[...]
    # TODO(synk): dropout on the context vector omitted (eval-mode identity).

    # ---- ContextualAttentionRegularized
    hs_n2 = _layer_norm(hs2, ln1_g_ref[...], ln1_b_ref[...])                      # [Bt*S, H]

    # fused Q/K/V projection: one [Bt*S, H] x [H, 3H] matmul
    qkv = mm(hs_n2, w_qkv_ref[...]) + b_qkv_ref[...]
    q3 = qkv[:, 0 * H:1 * H].reshape(Bt, S, H)
    k3 = qkv[:, 1 * H:2 * H].reshape(Bt, S, H)
    v3 = qkv[:, 2 * H:3 * H].reshape(Bt, S, H)
    # TODO(synk): if H % 128 != 0 these lane slices force relayout copies; for
    # such shapes either pad H to a 128 multiple or keep three separate matmuls.

    # fused context projections: [Bt, H] x [H, 2H]
    cv_qk = mm(cv, w_c_ref[...])
    cv_q = cv_qk[:, :H][:, None, :]                                               # [Bt, 1, H]
    cv_k = cv_qk[:, H:][:, None, :]                                               # [Bt, 1, H]

    # gate pre-activations via small MXU matmuls (weights fused host-side):
    #   gate_h[:, 0] == (hs_n @ Wq + bq) . g_qh,  gate_h[:, 1] == (hs_n @ Wk + bk) . g_kh
    #   gate_c[:, 0] == cv . g_qc,                gate_c[:, 1] == cv . g_kc
    gate_h = mm(hs_n2, w_gate_ref[...]) + b_gate_ref[...]                         # [Bt*S, 2]
    gate_c = mm(cv, w_cgate_ref[...])                                             # [Bt, 2]
    gate = jax.nn.sigmoid(gate_h.reshape(Bt, S, 2) + gate_c[:, None, :])          # [Bt, S, 2]
    q_gate = gate[..., 0:1]                                                       # [Bt, S, 1]
    k_gate = gate[..., 1:2]

    # x + g*(cv - x): one fewer [Bt,S,H] multiply than (1-g)*x + g*cv
    q_hat = q3 + q_gate * (cv_q - q3)
    k_hat = k3 + k_gate * (cv_k - k3)

    # fold the 1/sqrt(H) scale into q_hat (Bt*S*H multiply instead of Bt*S*S divide);
    # batched contraction over the last dims -> no transposed k_hat copy.
    scores = jnp.einsum("bqh,bkh->bqk",
                        (q_hat * inv_sqrt_h).astype(matmul_dtype),
                        k_hat.astype(matmul_dtype),
                        preferred_element_type=jnp.float32)
    probs = jax.nn.softmax(scores, axis=-1)
    # TODO(synk): attention-prob dropout omitted (eval-mode identity).
    attn = jnp.einsum("bqk,bkh->bqh",
                      probs.astype(matmul_dtype), v3.astype(matmul_dtype),
                      preferred_element_type=jnp.float32)

    out = _layer_norm(attn + hs_n2.reshape(Bt, S, H), ln2_g_ref[...], ln2_b_ref[...])
    # outer residual uses the ORIGINAL (un-normalized) hidden_states
    out = _layer_norm(out + hs3, ln3_g_ref[...], ln3_b_ref[...])

    out_ref[...] = out.astype(out_ref.dtype)
    scores_ref[...] = scores.astype(scores_ref.dtype)
    # TODO(synk): for large S, add a second grid axis over query tiles (and hoist
    # cv out of that loop) so the S^2 scores/probs slabs stay VMEM-resident on
    # v7x's 64 MiB; not needed at these problem sizes.


# ------------------------------------------------------------------ wrapper --

_PARAM_ORDER = ("w_ff1", "b_ff1", "w_ff2", "b_ff2",
                "ln1_g", "ln1_b",
                "w_qkv", "b_qkv", "w_c",
                "w_gate", "b_gate", "w_cgate",
                "ln2_g", "ln2_b", "ln3_g", "ln3_b")


def fuse_params(p):
    """Build the fused kernel weights ONCE (at parameter-load time, not per call)."""
    return {
        "w_ff1": p["w_ff1"], "b_ff1": p["b_ff1"],
        "w_ff2": p["w_ff2"], "b_ff2": p["b_ff2"],
        "ln1_g": p["ln1_g"], "ln1_b": p["ln1_b"],
        # fused Q/K/V and context projections
        "w_qkv": jnp.concatenate([p["wq"], p["wk"], p["wv"]], axis=1),            # [H, 3H]
        "b_qkv": jnp.concatenate([p["bq"], p["bk"], p["bv"]], axis=1),            # [1, 3H]
        "w_c": jnp.concatenate([p["wcq"], p["wck"]], axis=1),                     # [H, 2H]
        # fused gate weights: q.g_qh == hs_n @ (Wq @ g_qh) + bq @ g_qh (assoc. of matmul)
        "w_gate": jnp.concatenate([p["wq"] @ p["qhg"].T, p["wk"] @ p["khg"].T], axis=1),  # [H, 2]
        "b_gate": jnp.concatenate([p["bq"] @ p["qhg"].T, p["bk"] @ p["khg"].T], axis=1),  # [1, 2]
        "w_cgate": jnp.concatenate([p["qcg"].T, p["kcg"].T], axis=1),             # [H, 2]
        "ln2_g": p["ln2_g"], "ln2_b": p["ln2_b"],
        "ln3_g": p["ln3_g"], "ln3_b": p["ln3_b"],
    }


def _vmem_limit_bytes():
    """Generation-aware scoped-VMEM cap (leave headroom for Mosaic scratch)."""
    try:
        cap = int(pltpu.get_tpu_info().vmem_capacity_bytes)
    except Exception:
        cap = 64 * 1024 * 1024  # conservative: v7x per-core physical VMEM
    # ~48 MiB on v7x (64 MiB phys), ~96 MiB on v5e/v6e (128 MiB phys)
    return int(min(cap * 3 // 4, 100 * 1024 * 1024))


def _choose_block_batch(B, S, H, vmem_limit, weight_bytes, weight_buffers):
    """Largest divisor of B whose FULL in-kernel footprint fits the VMEM budget."""
    # Per batch item (f32): ~16x S*H slabs (hs, hs_n, qkv(=3), q/k/v_hat, attn, out,
    # double-buffered in/out blocks) and ~5x S*S (scores, probs, double-buffered out).
    per_item = 4 * (16 * S * H + 5 * S * S)
    budget = vmem_limit - weight_buffers * weight_bytes
    max_bt = max(1, budget // max(per_item, 1))
    if B >= 2:
        # Keep >=2 grid steps so the "parallel" axis can shard across both v7x
        # TensorCores (negligible extra per-step overhead on v5e/v6e).
        max_bt = min(max_bt, B // 2)
    bt = 1
    for cand in range(1, B + 1):
        if B % cand == 0 and cand <= max_bt:
            bt = cand
    return bt


def _build_pallas_fn(hs_shape, hs_dtype, param_list, Bt, vmem_limit,
                     single_buffer_weights, matmul_dtype):
    B, S, H = hs_shape

    if single_buffer_weights:
        def w_spec(p):
            # Grid-invariant weights: single-buffer (index_map is constant).
            return pl.BlockSpec(p.shape, lambda b: (0, 0), pipeline_mode=pl.Buffered(1))
    else:
        def w_spec(p):
            return pl.BlockSpec(p.shape, lambda b: (0, 0))

    in_specs = [pl.BlockSpec((Bt, S, H), lambda b: (b, 0, 0))]
    in_specs += [w_spec(p) for p in param_list]

    out_specs = [pl.BlockSpec((Bt, S, H), lambda b: (b, 0, 0)),
                 pl.BlockSpec((Bt, S, S), lambda b: (b, 0, 0))]
    out_shape = [jax.ShapeDtypeStruct((B, S, H), hs_dtype),
                 jax.ShapeDtypeStruct((B, S, S), jnp.float32)]
    # TODO(synk): for lane-dense stores, pad S/H to 128 multiples in the wrapper
    # (requires softmax masking for padded keys); skipped at these shapes.

    return pl.pallas_call(
        functools.partial(gcl_kernel, matmul_dtype=matmul_dtype),
        grid=(B // Bt,),
        in_specs=in_specs,
        out_specs=out_specs,
        out_shape=out_shape,
        compiler_params=pltpu.CompilerParams(
            dimension_semantics=("parallel",),     # batch blocks are independent
            vmem_limit_bytes=int(vmem_limit),
        ),
    )


def global_context_layer_pallas(hs, fused_params, matmul_dtype=jnp.float32):
    B, S, H = hs.shape
    param_list = [fused_params[name] for name in _PARAM_ORDER]
    weight_bytes = 4 * sum(int(p.size) for p in param_list)
    vmem_limit = _vmem_limit_bytes()

    last_err = None
    for single_buffer in (True, False):
        wbuf = 1 if single_buffer else 2
        Bt = _choose_block_batch(B, S, H, vmem_limit, weight_bytes, wbuf)
        try:
            fn = _build_pallas_fn(hs.shape, hs.dtype, param_list, Bt, vmem_limit,
                                  single_buffer, matmul_dtype)
            out = fn(hs, *param_list)
            return jax.block_until_ready(out)
        except Exception as e:  # noqa: BLE001
            # TODO(synk): pl.Buffered(1) single-buffering of grid-invariant weights
            # may be unsupported on some jax builds; fall back to default buffering.
            last_err = e
            if not single_buffer:
                raise
    raise last_err  # unreachable


# ---------------------------------------------------------------- reference --

def global_context_layer_ref(hs, p):
    """Pure-JAX reference mirroring the PyTorch forward (eval mode, unfused weights)."""
    def ln(x, g, b, eps=1e-5):
        mu = jnp.mean(x, axis=-1, keepdims=True)
        var = jnp.mean((x - mu) ** 2, axis=-1, keepdims=True)
        return (x - mu) * jax.lax.rsqrt(var + eps) * g + b

    cv = jnp.mean(hs, axis=1)                                      # [B, H]
    cv = jnp.maximum(cv @ p["w_ff1"] + p["b_ff1"], 0.0) @ p["w_ff2"] + p["b_ff2"]

    hs_n = ln(hs, p["ln1_g"], p["ln1_b"])
    q = hs_n @ p["wq"] + p["bq"]
    k = hs_n @ p["wk"] + p["bk"]
    v = hs_n @ p["wv"] + p["bv"]

    q_gate = jax.nn.sigmoid(jnp.sum(q * p["qhg"], -1, keepdims=True)
                            + jnp.sum(cv * p["qcg"], -1, keepdims=True)[:, None, :])
    k_gate = jax.nn.sigmoid(jnp.sum(k * p["khg"], -1, keepdims=True)
                            + jnp.sum(cv * p["kcg"], -1, keepdims=True)[:, None, :])
    cv_q = (cv @ p["wcq"])[:, None, :]
    cv_k = (cv @ p["wck"])[:, None, :]
    q_hat = (1 - q_gate) * q + q_gate * cv_q
    k_hat = (1 - k_gate) * k + k_gate * cv_k

    H = hs.shape[-1]
    scores = jnp.einsum("bqh,bkh->bqk", q_hat, k_hat) / jnp.sqrt(jnp.float32(H))
    probs = jax.nn.softmax(scores, axis=-1)
    out = jnp.einsum("bqk,bkh->bqh", probs, v)
    out = ln(out + hs_n, p["ln2_g"], p["ln2_b"])
    out = ln(out + hs, p["ln3_g"], p["ln3_b"])
    return out, scores


def make_params(key, H):
    ks = jax.random.split(key, 12)
    f32 = jnp.float32
    scale = 0.05
    params = {
        # ff_layer: Linear(H, 4H) -> ReLU -> Linear(4H, H); weights stored [in, out]
        "w_ff1": jax.random.normal(ks[0], (H, 4 * H), f32) * scale,
        "b_ff1": jax.random.normal(ks[1], (1, 4 * H), f32) * scale,
        "w_ff2": jax.random.normal(ks[2], (4 * H, H), f32) * scale,
        "b_ff2": jax.random.normal(ks[3], (1, H), f32) * scale,
        # attention projections (stored [in, out])
        "wq": jax.random.normal(ks[4], (H, H), f32) * scale,
        "bq": jax.random.normal(ks[5], (1, H), f32) * scale,
        "wk": jax.random.normal(ks[6], (H, H), f32) * scale,
        "bk": jax.random.normal(ks[7], (1, H), f32) * scale,
        "wv": jax.random.normal(ks[8], (H, H), f32) * scale,
        "bv": jax.random.normal(ks[9], (1, H), f32) * scale,
        # context projections (biases unused in the PyTorch forward)
        "wcq": jax.random.normal(ks[10], (H, H), f32) * scale,
        "wck": jax.random.normal(ks[11], (H, H), f32) * scale,
        # layer norms: ln1/ln2 inside attention, ln3 = outer layer_norm
        "ln1_g": jnp.ones((1, H), f32), "ln1_b": jnp.zeros((1, H), f32),
        "ln2_g": jnp.ones((1, H), f32), "ln2_b": jnp.zeros((1, H), f32),
        "ln3_g": jnp.ones((1, H), f32), "ln3_b": jnp.zeros((1, H), f32),
    }
    # gate parameters: nn.Parameter(torch.randn(H, 1)) — stored transposed as [1, H]
    gk = jax.random.split(jax.random.fold_in(key, 123), 4)
    params["qhg"] = jax.random.normal(gk[0], (1, H), f32)
    params["khg"] = jax.random.normal(gk[1], (1, H), f32)
    params["qcg"] = jax.random.normal(gk[2], (1, H), f32)
    params["kcg"] = jax.random.normal(gk[3], (1, H), f32)
    return params


if __name__ == "__main__":
    B, S, H = 2, 8, 32
    key = jax.random.PRNGKey(0)
    k_x, k_p = jax.random.split(key)
    hidden_states = jax.random.normal(k_x, (B, S, H), jnp.float32)
    params = make_params(k_p, H)
    fused = fuse_params(params)        # built once, reused across calls

    # matmul_dtype stays f32 to hold the 1e-4 tolerance; on v6e/v7x pass
    # matmul_dtype=jnp.bfloat16 for peak MXU throughput at looser tolerance.
    out, scores = global_context_layer_pallas(hidden_states, fused)
    out, scores = jax.block_until_ready((out, scores))

    out_ref, scores_ref = global_context_layer_ref(hidden_states, params)
    assert out.shape == (B, S, H) and scores.shape == (B, S, S)
    assert jnp.allclose(out, out_ref, atol=1e-4, rtol=1e-4)
    assert jnp.allclose(scores, scores_ref, atol=1e-4, rtol=1e-4)

    print("KERNEL_OK")
</pallas_src>

<mosaic_0001>
module attributes {stable_mosaic.version = 11 : i64} {
  func.func @gcl_kernel(%arg0: i32, %arg1: memref<1x8x32xf32, #tpu.memory_space<vmem>>, %arg2: memref<32x128xf32, #tpu.memory_space<vmem>>, %arg3: memref<1x128xf32, #tpu.memory_space<vmem>>, %arg4: memref<128x32xf32, #tpu.memory_space<vmem>>, %arg5: memref<1x32xf32, #tpu.memory_space<vmem>>, %arg6: memref<1x32xf32, #tpu.memory_space<vmem>>, %arg7: memref<1x32xf32, #tpu.memory_space<vmem>>, %arg8: memref<32x96xf32, #tpu.memory_space<vmem>>, %arg9: memref<1x96xf32, #tpu.memory_space<vmem>>, %arg10: memref<32x64xf32, #tpu.memory_space<vmem>>, %arg11: memref<32x2xf32, #tpu.memory_space<vmem>>, %arg12: memref<1x2xf32, #tpu.memory_space<vmem>>, %arg13: memref<32x2xf32, #tpu.memory_space<vmem>>, %arg14: memref<1x32xf32, #tpu.memory_space<vmem>>, %arg15: memref<1x32xf32, #tpu.memory_space<vmem>>, %arg16: memref<1x32xf32, #tpu.memory_space<vmem>>, %arg17: memref<1x32xf32, #tpu.memory_space<vmem>>, %arg18: memref<1x8x32xf32, #tpu.memory_space<vmem>>, %arg19: memref<1x8x8xf32, #tpu.memory_space<vmem>>) attributes {dimension_semantics = [#tpu.dimension_semantics<parallel>], iteration_bounds = array<i64: 2>, scalar_prefetch = 0 : i64, scratch_operands = 0 : i64, tpu.core_type = #tpu.core_type<tc>, window_params = [{transform_indices = @transform_0, window_bounds = array<i64: 1, 8, 32>}, {pipeline_mode = #tpu.pipeline_mode<synchronous>, transform_indices = @transform_1, window_bounds = array<i64: 32, 128>}, {pipeline_mode = #tpu.pipeline_mode<synchronous>, transform_indices = @transform_2, window_bounds = array<i64: 1, 128>}, {pipeline_mode = #tpu.pipeline_mode<synchronous>, transform_indices = @transform_3, window_bounds = array<i64: 128, 32>}, {pipeline_mode = #tpu.pipeline_mode<synchronous>, transform_indices = @transform_4, window_bounds = array<i64: 1, 32>}, {pipeline_mode = #tpu.pipeline_mode<synchronous>, transform_indices = @transform_5, window_bounds = array<i64: 1, 32>}, {pipeline_mode = #tpu.pipeline_mode<synchronous>, transform_indices = @transform_6, window_bounds = array<i64: 1, 32>}, {pipeline_mode = #tpu.pipeline_mode<synchronous>, transform_indices = @transform_7, window_bounds = array<i64: 32, 96>}, {pipeline_mode = #tpu.pipeline_mode<synchronous>, transform_indices = @transform_8, window_bounds = array<i64: 1, 96>}, {pipeline_mode = #tpu.pipeline_mode<synchronous>, transform_indices = @transform_9, window_bounds = array<i64: 32, 64>}, {pipeline_mode = #tpu.pipeline_mode<synchronous>, transform_indices = @transform_10, window_bounds = array<i64: 32, 2>}, {pipeline_mode = #tpu.pipeline_mode<synchronous>, transform_indices = @transform_11, window_bounds = array<i64: 1, 2>}, {pipeline_mode = #tpu.pipeline_mode<synchronous>, transform_indices = @transform_12, window_bounds = array<i64: 32, 2>}, {pipeline_mode = #tpu.pipeline_mode<synchronous>, transform_indices = @transform_13, window_bounds = array<i64: 1, 32>}, {pipeline_mode = #tpu.pipeline_mode<synchronous>, transform_indices = @transform_14, window_bounds = array<i64: 1, 32>}, {pipeline_mode = #tpu.pipeline_mode<synchronous>, transform_indices = @transform_15, window_bounds = array<i64: 1, 32>}, {pipeline_mode = #tpu.pipeline_mode<synchronous>, transform_indices = @transform_16, window_bounds = array<i64: 1, 32>}, {transform_indices = @transform_17, window_bounds = array<i64: 1, 8, 32>}, {transform_indices = @transform_18, window_bounds = array<i64: 1, 8, 8>}]} {
    %c0 = arith.constant 0 : index
    %c0_0 = arith.constant 0 : index
    %c0_1 = arith.constant 0 : index
    %0 = vector.load %arg1[%c0, %c0_0, %c0_1] : memref<1x8x32xf32, #tpu.memory_space<vmem>>, vector<1x8x32xf32>
    %1 = vector.shape_cast %0 : vector<1x8x32xf32> to vector<8x32xf32>
    %cst = arith.constant dense<0.000000e+00> : vector<1x32xf32>
    %2 = vector.multi_reduction <add>, %0, %cst [1] : vector<1x8x32xf32> to vector<1x32xf32>
    %cst_2 = arith.constant 8.000000e+00 : f32
    %3 = vector.broadcast %cst_2 : f32 to vector<1x32xf32>
    %4 = arith.divf %2, %3 : vector<1x32xf32>
    %c0_3 = arith.constant 0 : index
    %c0_4 = arith.constant 0 : index
    %5 = vector.load %arg2[%c0_3, %c0_4] : memref<32x128xf32, #tpu.memory_space<vmem>>, vector<32x128xf32>
    %cst_5 = arith.constant dense<0.000000e+00> : vector<1x128xf32>
    %6 = tpu.matmul %4, %5, %cst_5 {dimension_numbers = #tpu.dot_dimension_numbers<[1], [0], [0], [1], [0, 0, 1, 1], [], []>} : vector<1x32xf32>, vector<32x128xf32>, vector<1x128xf32> -> vector<1x128xf32>
    %c0_6 = arith.constant 0 : index
    %c0_7 = arith.constant 0 : index
    %7 = vector.load %arg3[%c0_6, %c0_7] : memref<1x128xf32, #tpu.memory_space<vmem>>, vector<1x128xf32>
    %8 = arith.addf %6, %7 : vector<1x128xf32>
    %cst_8 = arith.constant 0.000000e+00 : f32
    %9 = vector.broadcast %cst_8 : f32 to vector<1x128xf32>
    %10 = arith.maximumf %8, %9 : vector<1x128xf32>
    %c0_9 = arith.constant 0 : index
    %c0_10 = arith.constant 0 : index
    %11 = vector.load %arg4[%c0_9, %c0_10] : memref<128x32xf32, #tpu.memory_space<vmem>>, vector<128x32xf32>
    %cst_11 = arith.constant dense<0.000000e+00> : vector<1x32xf32>
    %12 = tpu.matmul %10, %11, %cst_11 {dimension_numbers = #tpu.dot_dimension_numbers<[1], [0], [0], [1], [0, 0, 1, 1], [], []>} : vector<1x128xf32>, vector<128x32xf32>, vector<1x32xf32> -> vector<1x32xf32>
    %c0_12 = arith.constant 0 : index
    %c0_13 = arith.constant 0 : index
    %13 = vector.load %arg5[%c0_12, %c0_13] : memref<1x32xf32, #tpu.memory_space<vmem>>, vector<1x32xf32>
    %14 = arith.addf %12, %13 : vector<1x32xf32>
    %c0_14 = arith.constant 0 : index
    %c0_15 = arith.constant 0 : index
    %15 = vector.load %arg6[%c0_14, %c0_15] : memref<1x32xf32, #tpu.memory_space<vmem>>, vector<1x32xf32>
    %c0_16 = arith.constant 0 : index
    %c0_17 = arith.constant 0 : index
    %16 = vector.load %arg7[%c0_16, %c0_17] : memref<1x32xf32, #tpu.memory_space<vmem>>, vector<1x32xf32>
    %cst_18 = arith.constant dense<0.000000e+00> : vector<8xf32>
    %17 = vector.multi_reduction <add>, %1, %cst_18 [1] : vector<8x32xf32> to vector<8xf32>
    %18 = vector.shape_cast %17 : vector<8xf32> to vector<8x1xf32>
    %cst_19 = arith.constant 3.200000e+01 : f32
    %19 = vector.broadcast %cst_19 : f32 to vector<8x1xf32>
    %20 = arith.divf %18, %19 : vector<8x1xf32>
    %21 = arith.mulf %1, %1 : vector<8x32xf32>
    %cst_20 = arith.constant dense<0.000000e+00> : vector<8xf32>
    %22 = vector.multi_reduction <add>, %21, %cst_20 [1] : vector<8x32xf32> to vector<8xf32>
    %23 = vector.shape_cast %22 : vector<8xf32> to vector<8x1xf32>
    %cst_21 = arith.constant 3.200000e+01 : f32
    %24 = vector.broadcast %cst_21 : f32 to vector<8x1xf32>
    %25 = arith.divf %23, %24 : vector<8x1xf32>
    %26 = arith.mulf %20, %20 : vector<8x1xf32>
    %27 = arith.subf %25, %26 : vector<8x1xf32>
    %28 = vector.broadcast %20 : vector<8x1xf32> to vector<8x32xf32>
    %29 = arith.subf %1, %28 : vector<8x32xf32>
    %cst_22 = arith.constant 9.99999974E-6 : f32
    %30 = vector.broadcast %cst_22 : f32 to vector<8x1xf32>
    %31 = arith.addf %27, %30 : vector<8x1xf32>
    %32 = math.rsqrt %31 : vector<8x1xf32>
    %33 = vector.broadcast %32 : vector<8x1xf32> to vector<8x32xf32>
    %34 = arith.mulf %29, %33 : vector<8x32xf32>
    %35 = vector.broadcast %15 : vector<1x32xf32> to vector<8x32xf32>
    %36 = arith.mulf %34, %35 : vector<8x32xf32>
    %37 = vector.broadcast %16 : vector<1x32xf32> to vector<8x32xf32>
    %38 = arith.addf %36, %37 : vector<8x32xf32>
    %c0_23 = arith.constant 0 : index
    %c0_24 = arith.constant 0 : index
    %39 = vector.load %arg8[%c0_23, %c0_24] : memref<32x96xf32, #tpu.memory_space<vmem>>, vector<32x96xf32>
    %cst_25 = arith.constant dense<0.000000e+00> : vector<8x96xf32>
    %40 = tpu.matmul %38, %39, %cst_25 {dimension_numbers = #tpu.dot_dimension_numbers<[1], [0], [0], [1], [0, 0, 1, 1], [], []>} : vector<8x32xf32>, vector<32x96xf32>, vector<8x96xf32> -> vector<8x96xf32>
    %c0_26 = arith.constant 0 : index
    %c0_27 = arith.constant 0 : index
    %41 = vector.load %arg9[%c0_26, %c0_27] : memref<1x96xf32, #tpu.memory_space<vmem>>, vector<1x96xf32>
    %42 = vector.broadcast %41 : vector<1x96xf32> to vector<8x96xf32>
    %43 = arith.addf %40, %42 : vector<8x96xf32>
    %44 = vector.extract_strided_slice %43 {offsets = [0, 0], sizes = [8, 32], strides = [1, 1]} : vector<8x96xf32> to vector<8x32xf32>
    %45 = vector.shape_cast %44 : vector<8x32xf32> to vector<1x8x32xf32>
    %46 = vector.extract_strided_slice %43 {offsets = [0, 32], sizes = [8, 32], strides = [1, 1]} : vector<8x96xf32> to vector<8x32xf32>
    %47 = vector.shape_cast %46 : vector<8x32xf32> to vector<1x8x32xf32>
    %48 = vector.extract_strided_slice %43 {offsets = [0, 64], sizes = [8, 32], strides = [1, 1]} : vector<8x96xf32> to vector<8x32xf32>
    %49 = vector.shape_cast %48 : vector<8x32xf32> to vector<1x8x32xf32>
    %c0_28 = arith.constant 0 : index
    %c0_29 = arith.constant 0 : index
    %50 = vector.load %arg10[%c0_28, %c0_29] : memref<32x64xf32, #tpu.memory_space<vmem>>, vector<32x64xf32>
    %cst_30 = arith.constant dense<0.000000e+00> : vector<1x64xf32>
    %51 = tpu.matmul %14, %50, %cst_30 {dimension_numbers = #tpu.dot_dimension_numbers<[1], [0], [0], [1], [0, 0, 1, 1], [], []>} : vector<1x32xf32>, vector<32x64xf32>, vector<1x64xf32> -> vector<1x64xf32>
    %52 = vector.extract_strided_slice %51 {offsets = [0, 0], sizes = [1, 32], strides = [1, 1]} : vector<1x64xf32> to vector<1x32xf32>
    %53 = vector.shape_cast %52 : vector<1x32xf32> to vector<1x1x32xf32>
    %54 = vector.extract_strided_slice %51 {offsets = [0, 32], sizes = [1, 32], strides = [1, 1]} : vector<1x64xf32> to vector<1x32xf32>
    %55 = vector.shape_cast %54 : vector<1x32xf32> to vector<1x1x32xf32>
    %c0_31 = arith.constant 0 : index
    %c0_32 = arith.constant 0 : index
    %56 = vector.load %arg11[%c0_31, %c0_32] : memref<32x2xf32, #tpu.memory_space<vmem>>, vector<32x2xf32>
    %cst_33 = arith.constant dense<0.000000e+00> : vector<8x2xf32>
    %57 = tpu.matmul %38, %56, %cst_33 {dimension_numbers = #tpu.dot_dimension_numbers<[1], [0], [0], [1], [0, 0, 1, 1], [], []>} : vector<8x32xf32>, vector<32x2xf32>, vector<8x2xf32> -> vector<8x2xf32>
    %c0_34 = arith.constant 0 : index
    %c0_35 = arith.constant 0 : index
    %58 = vector.load %arg12[%c0_34, %c0_35] : memref<1x2xf32, #tpu.memory_space<vmem>>, vector<1x2xf32>
    %59 = vector.broadcast %58 : vector<1x2xf32> to vector<8x2xf32>
    %60 = arith.addf %57, %59 : vector<8x2xf32>
    %c0_36 = arith.constant 0 : index
    %c0_37 = arith.constant 0 : index
    %61 = vector.load %arg13[%c0_36, %c0_37] : memref<32x2xf32, #tpu.memory_space<vmem>>, vector<32x2xf32>
    %cst_38 = arith.constant dense<0.000000e+00> : vector<1x2xf32>
    %62 = tpu.matmul %14, %61, %cst_38 {dimension_numbers = #tpu.dot_dimension_numbers<[1], [0], [0], [1], [0, 0, 1, 1], [], []>} : vector<1x32xf32>, vector<32x2xf32>, vector<1x2xf32> -> vector<1x2xf32>
    %63 = vector.shape_cast %60 : vector<8x2xf32> to vector<1x8x2xf32>
    %64 = vector.shape_cast %62 : vector<1x2xf32> to vector<1x1x2xf32>
    %65 = vector.broadcast %64 : vector<1x1x2xf32> to vector<1x8x2xf32>
    %66 = arith.addf %63, %65 : vector<1x8x2xf32>
    %67 = arith.negf %66 : vector<1x8x2xf32>
    %68 = math.exp %67 : vector<1x8x2xf32>
    %cst_39 = arith.constant 1.000000e+00 : f32
    %69 = vector.broadcast %cst_39 : f32 to vector<1x8x2xf32>
    %70 = arith.addf %69, %68 : vector<1x8x2xf32>
    %71 = arith.divf %69, %70 : vector<1x8x2xf32>
    %72 = vector.extract_strided_slice %71 {offsets = [0, 0, 0], sizes = [1, 8, 1], strides = [1, 1, 1]} : vector<1x8x2xf32> to vector<1x8x1xf32>
    %73 = vector.extract_strided_slice %71 {offsets = [0, 0, 1], sizes = [1, 8, 1], strides = [1, 1, 1]} : vector<1x8x2xf32> to vector<1x8x1xf32>
    %74 = vector.broadcast %53 : vector<1x1x32xf32> to vector<1x8x32xf32>
    %75 = arith.subf %74, %45 : vector<1x8x32xf32>
    %76 = vector.broadcast %72 : vector<1x8x1xf32> to vector<1x8x32xf32>
    %77 = arith.mulf %76, %75 : vector<1x8x32xf32>
    %78 = arith.addf %45, %77 : vector<1x8x32xf32>
    %79 = vector.broadcast %55 : vector<1x1x32xf32> to vector<1x8x32xf32>
    %80 = arith.subf %79, %47 : vector<1x8x32xf32>
    %81 = vector.broadcast %73 : vector<1x8x1xf32> to vector<1x8x32xf32>
    %82 = arith.mulf %81, %80 : vector<1x8x32xf32>
    %83 = arith.addf %47, %82 : vector<1x8x32xf32>
    %cst_40 = arith.constant 0.176776692 : f32
    %84 = vector.broadcast %cst_40 : f32 to vector<1x8x32xf32>
    %85 = arith.mulf %78, %84 : vector<1x8x32xf32>
    "tpu.trace_start"() <{level = 10 : i32, message = "bqh,bkh->bqk"}> : () -> ()
    %cst_41 = arith.constant dense<0.000000e+00> : vector<1x8x8xf32>
    %86 = tpu.matmul %85, %83, %cst_41 {dimension_numbers = #tpu.dot_dimension_numbers<[2], [2], [1], [1], [0, 0, 0, 1, 1, 1], [0], [0]>} : vector<1x8x32xf32>, vector<1x8x32xf32>, vector<1x8x8xf32> -> vector<1x8x8xf32>
    "tpu.trace_stop"() : () -> ()
    %cst_42 = arith.constant dense<0xFF800000> : vector<1x8xf32>
    %87 = vector.multi_reduction <maximumf>, %86, %cst_42 [2] : vector<1x8x8xf32> to vector<1x8xf32>
    %cst_43 = arith.constant 0xFF800000 : f32
    %88 = vector.broadcast %cst_43 : f32 to vector<1x8xf32>
    %89 = arith.maximumf %88, %87 : vector<1x8xf32>
    %90 = vector.shape_cast %89 : vector<1x8xf32> to vector<1x8x1xf32>
    %91 = vector.broadcast %90 : vector<1x8x1xf32> to vector<1x8x8xf32>
    %92 = arith.subf %86, %91 : vector<1x8x8xf32>
    %93 = math.exp %92 : vector<1x8x8xf32>
    %cst_44 = arith.constant dense<0.000000e+00> : vector<1x8xf32>
    %94 = vector.multi_reduction <add>, %93, %cst_44 [2] : vector<1x8x8xf32> to vector<1x8xf32>
    %95 = vector.shape_cast %94 : vector<1x8xf32> to vector<1x8x1xf32>
    %96 = vector.broadcast %95 : vector<1x8x1xf32> to vector<1x8x8xf32>
    %97 = arith.divf %93, %96 : vector<1x8x8xf32>
    "tpu.trace_start"() <{level = 10 : i32, message = "bqk,bkh->bqh"}> : () -> ()
    %cst_45 = arith.constant dense<0.000000e+00> : vector<1x8x32xf32>
    %98 = tpu.matmul %97, %49, %cst_45 {dimension_numbers = #tpu.dot_dimension_numbers<[2], [1], [1], [2], [0, 0, 0, 1, 1, 2], [0], [0]>} : vector<1x8x8xf32>, vector<1x8x32xf32>, vector<1x8x32xf32> -> vector<1x8x32xf32>
    "tpu.trace_stop"() : () -> ()
    %99 = vector.shape_cast %38 : vector<8x32xf32> to vector<1x8x32xf32>
    %100 = arith.addf %98, %99 : vector<1x8x32xf32>
    %c0_46 = arith.constant 0 : index
    %c0_47 = arith.constant 0 : index
    %101 = vector.load %arg14[%c0_46, %c0_47] : memref<1x32xf32, #tpu.memory_space<vmem>>, vector<1x32xf32>
    %c0_48 = arith.constant 0 : index
    %c0_49 = arith.constant 0 : index
    %102 = vector.load %arg15[%c0_48, %c0_49] : memref<1x32xf32, #tpu.memory_space<vmem>>, vector<1x32xf32>
    %cst_50 = arith.constant dense<0.000000e+00> : vector<1x8xf32>
    %103 = vector.multi_reduction <add>, %100, %cst_50 [2] : vector<1x8x32xf32> to vector<1x8xf32>
    %104 = vector.shape_cast %103 : vector<1x8xf32> to vector<1x8x1xf32>
    %cst_51 = arith.constant 3.200000e+01 : f32
    %105 = vector.broadcast %cst_51 : f32 to vector<1x8x1xf32>
    %106 = arith.divf %104, %105 : vector<1x8x1xf32>
    %107 = arith.mulf %100, %100 : vector<1x8x32xf32>
    %cst_52 = arith.constant dense<0.000000e+00> : vector<1x8xf32>
    %108 = vector.multi_reduction <add>, %107, %cst_52 [2] : vector<1x8x32xf32> to vector<1x8xf32>
    %109 = vector.shape_cast %108 : vector<1x8xf32> to vector<1x8x1xf32>
    %cst_53 = arith.constant 3.200000e+01 : f32
    %110 = vector.broadcast %cst_53 : f32 to vector<1x8x1xf32>
    %111 = arith.divf %109, %110 : vector<1x8x1xf32>
    %112 = arith.mulf %106, %106 : vector<1x8x1xf32>
    %113 = arith.subf %111, %112 : vector<1x8x1xf32>
    %114 = vector.broadcast %106 : vector<1x8x1xf32> to vector<1x8x32xf32>
    %115 = arith.subf %100, %114 : vector<1x8x32xf32>
    %cst_54 = arith.constant 9.99999974E-6 : f32
    %116 = vector.broadcast %cst_54 : f32 to vector<1x8x1xf32>
    %117 = arith.addf %113, %116 : vector<1x8x1xf32>
    %118 = math.rsqrt %117 : vector<1x8x1xf32>
    %119 = vector.broadcast %118 : vector<1x8x1xf32> to vector<1x8x32xf32>
    %120 = arith.mulf %115, %119 : vector<1x8x32xf32>
    %121 = vector.shape_cast %101 : vector<1x32xf32> to vector<1x1x32xf32>
    %122 = vector.broadcast %121 : vector<1x1x32xf32> to vector<1x8x32xf32>
    %123 = arith.mulf %120, %122 : vector<1x8x32xf32>
    %124 = vector.shape_cast %102 : vector<1x32xf32> to vector<1x1x32xf32>
    %125 = vector.broadcast %124 : vector<1x1x32xf32> to vector<1x8x32xf32>
    %126 = arith.addf %123, %125 : vector<1x8x32xf32>
    %127 = arith.addf %126, %0 : vector<1x8x32xf32>
    %c0_55 = arith.constant 0 : index
    %c0_56 = arith.constant 0 : index
    %128 = vector.load %arg16[%c0_55, %c0_56] : memref<1x32xf32, #tpu.memory_space<vmem>>, vector<1x32xf32>
    %c0_57 = arith.constant 0 : index
    %c0_58 = arith.constant 0 : index
    %129 = vector.load %arg17[%c0_57, %c0_58] : memref<1x32xf32, #tpu.memory_space<vmem>>, vector<1x32xf32>
    %cst_59 = arith.constant dense<0.000000e+00> : vector<1x8xf32>
    %130 = vector.multi_reduction <add>, %127, %cst_59 [2] : vector<1x8x32xf32> to vector<1x8xf32>
    %131 = vector.shape_cast %130 : vector<1x8xf32> to vector<1x8x1xf32>
    %cst_60 = arith.constant 3.200000e+01 : f32
    %132 = vector.broadcast %cst_60 : f32 to vector<1x8x1xf32>
    %133 = arith.divf %131, %132 : vector<1x8x1xf32>
    %134 = arith.mulf %127, %127 : vector<1x8x32xf32>
    %cst_61 = arith.constant dense<0.000000e+00> : vector<1x8xf32>
    %135 = vector.multi_reduction <add>, %134, %cst_61 [2] : vector<1x8x32xf32> to vector<1x8xf32>
    %136 = vector.shape_cast %135 : vector<1x8xf32> to vector<1x8x1xf32>
    %cst_62 = arith.constant 3.200000e+01 : f32
    %137 = vector.broadcast %cst_62 : f32 to vector<1x8x1xf32>
    %138 = arith.divf %136, %137 : vector<1x8x1xf32>
    %139 = arith.mulf %133, %133 : vector<1x8x1xf32>
    %140 = arith.subf %138, %139 : vector<1x8x1xf32>
    %141 = vector.broadcast %133 : vector<1x8x1xf32> to vector<1x8x32xf32>
    %142 = arith.subf %127, %141 : vector<1x8x32xf32>
    %cst_63 = arith.constant 9.99999974E-6 : f32
    %143 = vector.broadcast %cst_63 : f32 to vector<1x8x1xf32>
    %144 = arith.addf %140, %143 : vector<1x8x1xf32>
    %145 = math.rsqrt %144 : vector<1x8x1xf32>
    %146 = vector.broadcast %145 : vector<1x8x1xf32> to vector<1x8x32xf32>
    %147 = arith.mulf %142, %146 : vector<1x8x32xf32>
    %148 = vector.shape_cast %128 : vector<1x32xf32> to vector<1x1x32xf32>
    %149 = vector.broadcast %148 : vector<1x1x32xf32> to vector<1x8x32xf32>
    %150 = arith.mulf %147, %149 : vector<1x8x32xf32>
    %151 = vector.shape_cast %129 : vector<1x32xf32> to vector<1x1x32xf32>
    %152 = vector.broadcast %151 : vector<1x1x32xf32> to vector<1x8x32xf32>
    %153 = arith.addf %150, %152 : vector<1x8x32xf32>
    %c0_64 = arith.constant 0 : index
    %c0_65 = arith.constant 0 : index
    %c0_66 = arith.constant 0 : index
    %154 = vector.load %arg18[%c0_64, %c0_65, %c0_66] : memref<1x8x32xf32, #tpu.memory_space<vmem>>, vector<1x8x32xf32>
    tpu.vector_store %arg18[%c0_64, %c0_65, %c0_66], %153 {strides = array<i32>} : memref<1x8x32xf32, #tpu.memory_space<vmem>>, vector<1x8x32xf32>,
    %c0_67 = arith.constant 0 : index
    %c0_68 = arith.constant 0 : index
    %c0_69 = arith.constant 0 : index
    %155 = vector.load %arg19[%c0_67, %c0_68, %c0_69] : memref<1x8x8xf32, #tpu.memory_space<vmem>>, vector<1x8x8xf32>
    tpu.vector_store %arg19[%c0_67, %c0_68, %c0_69], %86 {strides = array<i32>} : memref<1x8x8xf32, #tpu.memory_space<vmem>>, vector<1x8x8xf32>,
    return
  }
  func.func @transform_0(%arg0: i32) -> (i32, i32, i32) {
    %c0_i32 = arith.constant 0 : i32
    %c0_i32_0 = arith.constant 0 : i32
    %c0_i32_1 = arith.constant 0 : i32
    return %arg0, %c0_i32, %c0_i32_0 : i32, i32, i32
  }
  func.func @transform_1(%arg0: i32) -> (i32, i32) {
    %c0_i32 = arith.constant 0 : i32
    %c0_i32_0 = arith.constant 0 : i32
    %c0_i32_1 = arith.constant 0 : i32
    return %c0_i32, %c0_i32_0 : i32, i32
  }
  func.func @transform_2(%arg0: i32) -> (i32, i32) {
    %c0_i32 = arith.constant 0 : i32
    %c0_i32_0 = arith.constant 0 : i32
    %c0_i32_1 = arith.constant 0 : i32
    return %c0_i32, %c0_i32_0 : i32, i32
  }
  func.func @transform_3(%arg0: i32) -> (i32, i32) {
    %c0_i32 = arith.constant 0 : i32
    %c0_i32_0 = arith.constant 0 : i32
    %c0_i32_1 = arith.constant 0 : i32
    return %c0_i32, %c0_i32_0 : i32, i32
  }
  func.func @transform_4(%arg0: i32) -> (i32, i32) {
    %c0_i32 = arith.constant 0 : i32
    %c0_i32_0 = arith.constant 0 : i32
    %c0_i32_1 = arith.constant 0 : i32
    return %c0_i32, %c0_i32_0 : i32, i32
  }
  func.func @transform_5(%arg0: i32) -> (i32, i32) {
    %c0_i32 = arith.constant 0 : i32
    %c0_i32_0 = arith.constant 0 : i32
    %c0_i32_1 = arith.constant 0 : i32
    return %c0_i32, %c0_i32_0 : i32, i32
  }
  func.func @transform_6(%arg0: i32) -> (i32, i32) {
    %c0_i32 = arith.constant 0 : i32
    %c0_i32_0 = arith.constant 0 : i32
    %c0_i32_1 = arith.constant 0 : i32
    return %c0_i32, %c0_i32_0 : i32, i32
  }
  func.func @transform_7(%arg0: i32) -> (i32, i32) {
    %c0_i32 = arith.constant 0 : i32
    %c0_i32_0 = arith.constant 0 : i32
    %c0_i32_1 = arith.constant 0 : i32
    return %c0_i32, %c0_i32_0 : i32, i32
  }
  func.func @transform_8(%arg0: i32) -> (i32, i32) {
    %c0_i32 = arith.constant 0 : i32
    %c0_i32_0 = arith.constant 0 : i32
    %c0_i32_1 = arith.constant 0 : i32
    return %c0_i32, %c0_i32_0 : i32, i32
  }
  func.func @transform_9(%arg0: i32) -> (i32, i32) {
    %c0_i32 = arith.constant 0 : i32
    %c0_i32_0 = arith.constant 0 : i32
    %c0_i32_1 = arith.constant 0 : i32
    return %c0_i32, %c0_i32_0 : i32, i32
  }
  func.func @transform_10(%arg0: i32) -> (i32, i32) {
    %c0_i32 = arith.constant 0 : i32
    %c0_i32_0 = arith.constant 0 : i32
    %c0_i32_1 = arith.constant 0 : i32
    return %c0_i32, %c0_i32_0 : i32, i32
  }
  func.func @transform_11(%arg0: i32) -> (i32, i32) {
    %c0_i32 = arith.constant 0 : i32
    %c0_i32_0 = arith.constant 0 : i32
    %c0_i32_1 = arith.constant 0 : i32
    return %c0_i32, %c0_i32_0 : i32, i32
  }
  func.func @transform_12(%arg0: i32) -> (i32, i32) {
    %c0_i32 = arith.constant 0 : i32
    %c0_i32_0 = arith.constant 0 : i32
    %c0_i32_1 = arith.constant 0 : i32
    return %c0_i32, %c0_i32_0 : i32, i32
  }
  func.func @transform_13(%arg0: i32) -> (i32, i32) {
    %c0_i32 = arith.constant 0 : i32
    %c0_i32_0 = arith.constant 0 : i32
    %c0_i32_1 = arith.constant 0 : i32
    return %c0_i32, %c0_i32_0 : i32, i32
  }
  func.func @transform_14(%arg0: i32) -> (i32, i32) {
    %c0_i32 = arith.constant 0 : i32
    %c0_i32_0 = arith.constant 0 : i32
    %c0_i32_1 = arith.constant 0 : i32
    return %c0_i32, %c0_i32_0 : i32, i32
  }
  func.func @transform_15(%arg0: i32) -> (i32, i32) {
    %c0_i32 = arith.constant 0 : i32
    %c0_i32_0 = arith.constant 0 : i32
    %c0_i32_1 = arith.constant 0 : i32
    return %c0_i32, %c0_i32_0 : i32, i32
  }
  func.func @transform_16(%arg0: i32) -> (i32, i32) {
    %c0_i32 = arith.constant 0 : i32
    %c0_i32_0 = arith.constant 0 : i32
    %c0_i32_1 = arith.constant 0 : i32
    return %c0_i32, %c0_i32_0 : i32, i32
  }
  func.func @transform_17(%arg0: i32) -> (i32, i32, i32) {
    %c0_i32 = arith.constant 0 : i32
    %c0_i32_0 = arith.constant 0 : i32
    %c0_i32_1 = arith.constant 0 : i32
    return %arg0, %c0_i32, %c0_i32_0 : i32, i32, i32
  }
  func.func @transform_18(%arg0: i32) -> (i32, i32, i32) {
    %c0_i32 = arith.constant 0 : i32
    %c0_i32_0 = arith.constant 0 : i32
    %c0_i32_1 = arith.constant 0 : i32
    return %arg0, %c0_i32, %c0_i32_0 : i32, i32, i32
  }
}

module attributes {stable_mosaic.version = 11 : i64} {
  func.func @gcl_kernel(%arg0: i32, %arg1: memref<1x8x32xf32, #tpu.memory_space<vmem>>, %arg2: memref<32x128xf32, #tpu.memory_space<vmem>>, %arg3: memref<1x128xf32, #tpu.memory_space<vmem>>, %arg4: memref<128x32xf32, #tpu.memory_space<vmem>>, %arg5: memref<1x32xf32, #tpu.memory_space<vmem>>, %arg6: memref<1x32xf32, #tpu.memory_space<vmem>>, %arg7: memref<1x32xf32, #tpu.memory_space<vmem>>, %arg8: memref<32x96xf32, #tpu.memory_space<vmem>>, %arg9: memref<1x96xf32, #tpu.memory_space<vmem>>, %arg10: memref<32x64xf32, #tpu.memory_space<vmem>>, %arg11: memref<32x2xf32, #tpu.memory_space<vmem>>, %arg12: memref<1x2xf32, #tpu.memory_space<vmem>>, %arg13: memref<32x2xf32, #tpu.memory_space<vmem>>, %arg14: memref<1x32xf32, #tpu.memory_space<vmem>>, %arg15: memref<1x32xf32, #tpu.memory_space<vmem>>, %arg16: memref<1x32xf32, #tpu.memory_space<vmem>>, %arg17: memref<1x32xf32, #tpu.memory_space<vmem>>, %arg18: memref<1x8x32xf32, #tpu.memory_space<vmem>>, %arg19: memref<1x8x8xf32, #tpu.memory_space<vmem>>) attributes {dimension_semantics = [#tpu.dimension_semantics<parallel>], iteration_bounds = array<i64: 2>, scalar_prefetch = 0 : i64, scratch_operands = 0 : i64, tpu.core_type = #tpu.core_type<tc>, window_params = [{transform_indices = @transform_0, window_bounds = array<i64: 1, 8, 32>}, {pipeline_mode = #tpu.pipeline_mode<synchronous>, transform_indices = @transform_1, window_bounds = array<i64: 32, 128>}, {pipeline_mode = #tpu.pipeline_mode<synchronous>, transform_indices = @transform_2, window_bounds = array<i64: 1, 128>}, {pipeline_mode = #tpu.pipeline_mode<synchronous>, transform_indices = @transform_3, window_bounds = array<i64: 128, 32>}, {pipeline_mode = #tpu.pipeline_mode<synchronous>, transform_indices = @transform_4, window_bounds = array<i64: 1, 32>}, {pipeline_mode = #tpu.pipeline_mode<synchronous>, transform_indices = @transform_5, window_bounds = array<i64: 1, 32>}, {pipeline_mode = #tpu.pipeline_mode<synchronous>, transform_indices = @transform_6, window_bounds = array<i64: 1, 32>}, {pipeline_mode = #tpu.pipeline_mode<synchronous>, transform_indices = @transform_7, window_bounds = array<i64: 32, 96>}, {pipeline_mode = #tpu.pipeline_mode<synchronous>, transform_indices = @transform_8, window_bounds = array<i64: 1, 96>}, {pipeline_mode = #tpu.pipeline_mode<synchronous>, transform_indices = @transform_9, window_bounds = array<i64: 32, 64>}, {pipeline_mode = #tpu.pipeline_mode<synchronous>, transform_indices = @transform_10, window_bounds = array<i64: 32, 2>}, {pipeline_mode = #tpu.pipeline_mode<synchronous>, transform_indices = @transform_11, window_bounds = array<i64: 1, 2>}, {pipeline_mode = #tpu.pipeline_mode<synchronous>, transform_indices = @transform_12, window_bounds = array<i64: 32, 2>}, {pipeline_mode = #tpu.pipeline_mode<synchronous>, transform_indices = @transform_13, window_bounds = array<i64: 1, 32>}, {pipeline_mode = #tpu.pipeline_mode<synchronous>, transform_indices = @transform_14, window_bounds = array<i64: 1, 32>}, {pipeline_mode = #tpu.pipeline_mode<synchronous>, transform_indices = @transform_15, window_bounds = array<i64: 1, 32>}, {pipeline_mode = #tpu.pipeline_mode<synchronous>, transform_indices = @transform_16, window_bounds = array<i64: 1, 32>}, {transform_indices = @transform_17, window_bounds = array<i64: 1, 8, 32>}, {transform_indices = @transform_18, window_bounds = array<i64: 1, 8, 8>}]} {
    %c0 = arith.constant 0 : index
    %c0_0 = arith.constant 0 : index
    %c0_1 = arith.constant 0 : index
    %0 = vector.load %arg1[%c0, %c0_0, %c0_1] : memref<1x8x32xf32, #tpu.memory_space<vmem>>, vector<1x8x32xf32>
    %1 = vector.shape_cast %0 : vector<1x8x32xf32> to vector<8x32xf32>
    %cst = arith.constant dense<0.000000e+00> : vector<1x32xf32>
    %2 = vector.multi_reduction <add>, %0, %cst [1] : vector<1x8x32xf32> to vector<1x32xf32>
    %cst_2 = arith.constant 8.000000e+00 : f32
    %3 = vector.broadcast %cst_2 : f32 to vector<1x32xf32>
    %4 = arith.divf %2, %3 : vector<1x32xf32>
    %c0_3 = arith.constant 0 : index
    %c0_4 = arith.constant 0 : index
    %5 = vector.load %arg2[%c0_3, %c0_4] : memref<32x128xf32, #tpu.memory_space<vmem>>, vector<32x128xf32>
    %cst_5 = arith.constant dense<0.000000e+00> : vector<1x128xf32>
    %6 = tpu.matmul %4, %5, %cst_5 {dimension_numbers = #tpu.dot_dimension_numbers<[1], [0], [0], [1], [0, 0, 1, 1], [], []>} : vector<1x32xf32>, vector<32x128xf32>, vector<1x128xf32> -> vector<1x128xf32>
    %c0_6 = arith.constant 0 : index
    %c0_7 = arith.constant 0 : index
    %7 = vector.load %arg3[%c0_6, %c0_7] : memref<1x128xf32, #tpu.memory_space<vmem>>, vector<1x128xf32>
    %8 = arith.addf %6, %7 : vector<1x128xf32>
    %cst_8 = arith.constant 0.000000e+00 : f32
    %9 = vector.broadcast %cst_8 : f32 to vector<1x128xf32>
    %10 = arith.maximumf %8, %9 : vector<1x128xf32>
    %c0_9 = arith.constant 0 : index
    %c0_10 = arith.constant 0 : index
    %11 = vector.load %arg4[%c0_9, %c0_10] : memref<128x32xf32, #tpu.memory_space<vmem>>, vector<128x32xf32>
    %cst_11 = arith.constant dense<0.000000e+00> : vector<1x32xf32>
    %12 = tpu.matmul %10, %11, %cst_11 {dimension_numbers = #tpu.dot_dimension_numbers<[1], [0], [0], [1], [0, 0, 1, 1], [], []>} : vector<1x128xf32>, vector<128x32xf32>, vector<1x32xf32> -> vector<1x32xf32>
    %c0_12 = arith.constant 0 : index
    %c0_13 = arith.constant 0 : index
    %13 = vector.load %arg5[%c0_12, %c0_13] : memref<1x32xf32, #tpu.memory_space<vmem>>, vector<1x32xf32>
    %14 = arith.addf %12, %13 : vector<1x32xf32>
    %c0_14 = arith.constant 0 : index
    %c0_15 = arith.constant 0 : index
    %15 = vector.load %arg6[%c0_14, %c0_15] : memref<1x32xf32, #tpu.memory_space<vmem>>, vector<1x32xf32>
    %c0_16 = arith.constant 0 : index
    %c0_17 = arith.constant 0 : index
    %16 = vector.load %arg7[%c0_16, %c0_17] : memref<1x32xf32, #tpu.memory_space<vmem>>, vector<1x32xf32>
    %cst_18 = arith.constant dense<0.000000e+00> : vector<8xf32>
    %17 = vector.multi_reduction <add>, %1, %cst_18 [1] : vector<8x32xf32> to vector<8xf32>
    %18 = vector.shape_cast %17 : vector<8xf32> to vector<8x1xf32>
    %cst_19 = arith.constant 3.200000e+01 : f32
    %19 = vector.broadcast %cst_19 : f32 to vector<8x1xf32>
    %20 = arith.divf %18, %19 : vector<8x1xf32>
    %21 = arith.mulf %1, %1 : vector<8x32xf32>
    %cst_20 = arith.constant dense<0.000000e+00> : vector<8xf32>
    %22 = vector.multi_reduction <add>, %21, %cst_20 [1] : vector<8x32xf32> to vector<8xf32>
    %23 = vector.shape_cast %22 : vector<8xf32> to vector<8x1xf32>
    %cst_21 = arith.constant 3.200000e+01 : f32
    %24 = vector.broadcast %cst_21 : f32 to vector<8x1xf32>
    %25 = arith.divf %23, %24 : vector<8x1xf32>
    %26 = arith.mulf %20, %20 : vector<8x1xf32>
    %27 = arith.subf %25, %26 : vector<8x1xf32>
    %28 = vector.broadcast %20 : vector<8x1xf32> to vector<8x32xf32>
    %29 = arith.subf %1, %28 : vector<8x32xf32>
    %cst_22 = arith.constant 9.99999974E-6 : f32
    %30 = vector.broadcast %cst_22 : f32 to vector<8x1xf32>
    %31 = arith.addf %27, %30 : vector<8x1xf32>
    %32 = math.rsqrt %31 : vector<8x1xf32>
    %33 = vector.broadcast %32 : vector<8x1xf32> to vector<8x32xf32>
    %34 = arith.mulf %29, %33 : vector<8x32xf32>
    %35 = vector.broadcast %15 : vector<1x32xf32> to vector<8x32xf32>
    %36 = arith.mulf %34, %35 : vector<8x32xf32>
    %37 = vector.broadcast %16 : vector<1x32xf32> to vector<8x32xf32>
    %38 = arith.addf %36, %37 : vector<8x32xf32>
    %c0_23 = arith.constant 0 : index
    %c0_24 = arith.constant 0 : index
    %39 = vector.load %arg8[%c0_23, %c0_24] : memref<32x96xf32, #tpu.memory_space<vmem>>, vector<32x96xf32>
    %cst_25 = arith.constant dense<0.000000e+00> : vector<8x96xf32>
    %40 = tpu.matmul %38, %39, %cst_25 {dimension_numbers = #tpu.dot_dimension_numbers<[1], [0], [0], [1], [0, 0, 1, 1], [], []>} : vector<8x32xf32>, vector<32x96xf32>, vector<8x96xf32> -> vector<8x96xf32>
    %c0_26 = arith.constant 0 : index
    %c0_27 = arith.constant 0 : index
    %41 = vector.load %arg9[%c0_26, %c0_27] : memref<1x96xf32, #tpu.memory_space<vmem>>, vector<1x96xf32>
    %42 = vector.broadcast %41 : vector<1x96xf32> to vector<8x96xf32>
    %43 = arith.addf %40, %42 : vector<8x96xf32>
    %44 = vector.extract_strided_slice %43 {offsets = [0, 0], sizes = [8, 32], strides = [1, 1]} : vector<8x96xf32> to vector<8x32xf32>
    %45 = vector.shape_cast %44 : vector<8x32xf32> to vector<1x8x32xf32>
    %46 = vector.extract_strided_slice %43 {offsets = [0, 32], sizes = [8, 32], strides = [1, 1]} : vector<8x96xf32> to vector<8x32xf32>
    %47 = vector.shape_cast %46 : vector<8x32xf32> to vector<1x8x32xf32>
    %48 = vector.extract_strided_slice %43 {offsets = [0, 64], sizes = [8, 32], strides = [1, 1]} : vector<8x96xf32> to vector<8x32xf32>
    %49 = vector.shape_cast %48 : vector<8x32xf32> to vector<1x8x32xf32>
    %c0_28 = arith.constant 0 : index
    %c0_29 = arith.constant 0 : index
    %50 = vector.load %arg10[%c0_28, %c0_29] : memref<32x64xf32, #tpu.memory_space<vmem>>, vector<32x64xf32>
    %cst_30 = arith.constant dense<0.000000e+00> : vector<1x64xf32>
    %51 = tpu.matmul %14, %50, %cst_30 {dimension_numbers = #tpu.dot_dimension_numbers<[1], [0], [0], [1], [0, 0, 1, 1], [], []>} : vector<1x32xf32>, vector<32x64xf32>, vector<1x64xf32> -> vector<1x64xf32>
    %52 = vector.extract_strided_slice %51 {offsets = [0, 0], sizes = [1, 32], strides = [1, 1]} : vector<1x64xf32> to vector<1x32xf32>
    %53 = vector.shape_cast %52 : vector<1x32xf32> to vector<1x1x32xf32>
    %54 = vector.extract_strided_slice %51 {offsets = [0, 32], sizes = [1, 32], strides = [1, 1]} : vector<1x64xf32> to vector<1x32xf32>
    %55 = vector.shape_cast %54 : vector<1x32xf32> to vector<1x1x32xf32>
    %c0_31 = arith.constant 0 : index
    %c0_32 = arith.constant 0 : index
    %56 = vector.load %arg11[%c0_31, %c0_32] : memref<32x2xf32, #tpu.memory_space<vmem>>, vector<32x2xf32>
    %cst_33 = arith.constant dense<0.000000e+00> : vector<8x2xf32>
    %57 = tpu.matmul %38, %56, %cst_33 {dimension_numbers = #tpu.dot_dimension_numbers<[1], [0], [0], [1], [0, 0, 1, 1], [], []>} : vector<8x32xf32>, vector<32x2xf32>, vector<8x2xf32> -> vector<8x2xf32>
    %c0_34 = arith.constant 0 : index
    %c0_35 = arith.constant 0 : index
    %58 = vector.load %arg12[%c0_34, %c0_35] : memref<1x2xf32, #tpu.memory_space<vmem>>, vector<1x2xf32>
    %59 = vector.broadcast %58 : vector<1x2xf32> to vector<8x2xf32>
    %60 = arith.addf %57, %59 : vector<8x2xf32>
    %c0_36 = arith.constant 0 : index
    %c0_37 = arith.constant 0 : index
    %61 = vector.load %arg13[%c0_36, %c0_37] : memref<32x2xf32, #tpu.memory_space<vmem>>, vector<32x2xf32>
    %cst_38 = arith.constant dense<0.000000e+00> : vector<1x2xf32>
    %62 = tpu.matmul %14, %61, %cst_38 {dimension_numbers = #tpu.dot_dimension_numbers<[1], [0], [0], [1], [0, 0, 1, 1], [], []>} : vector<1x32xf32>, vector<32x2xf32>, vector<1x2xf32> -> vector<1x2xf32>
    %63 = vector.shape_cast %60 : vector<8x2xf32> to vector<1x8x2xf32>
    %64 = vector.shape_cast %62 : vector<1x2xf32> to vector<1x1x2xf32>
    %65 = vector.broadcast %64 : vector<1x1x2xf32> to vector<1x8x2xf32>
    %66 = arith.addf %63, %65 : vector<1x8x2xf32>
    %67 = arith.negf %66 : vector<1x8x2xf32>
    %68 = math.exp %67 : vector<1x8x2xf32>
    %cst_39 = arith.constant 1.000000e+00 : f32
    %69 = vector.broadcast %cst_39 : f32 to vector<1x8x2xf32>
    %70 = arith.addf %69, %68 : vector<1x8x2xf32>
    %71 = arith.divf %69, %70 : vector<1x8x2xf32>
    %72 = vector.extract_strided_slice %71 {offsets = [0, 0, 0], sizes = [1, 8, 1], strides = [1, 1, 1]} : vector<1x8x2xf32> to vector<1x8x1xf32>
    %73 = vector.extract_strided_slice %71 {offsets = [0, 0, 1], sizes = [1, 8, 1], strides = [1, 1, 1]} : vector<1x8x2xf32> to vector<1x8x1xf32>
    %74 = vector.broadcast %53 : vector<1x1x32xf32> to vector<1x8x32xf32>
    %75 = arith.subf %74, %45 : vector<1x8x32xf32>
    %76 = vector.broadcast %72 : vector<1x8x1xf32> to vector<1x8x32xf32>
    %77 = arith.mulf %76, %75 : vector<1x8x32xf32>
    %78 = arith.addf %45, %77 : vector<1x8x32xf32>
    %79 = vector.broadcast %55 : vector<1x1x32xf32> to vector<1x8x32xf32>
    %80 = arith.subf %79, %47 : vector<1x8x32xf32>
    %81 = vector.broadcast %73 : vector<1x8x1xf32> to vector<1x8x32xf32>
    %82 = arith.mulf %81, %80 : vector<1x8x32xf32>
    %83 = arith.addf %47, %82 : vector<1x8x32xf32>
    %cst_40 = arith.constant 0.176776692 : f32
    %84 = vector.broadcast %cst_40 : f32 to vector<1x8x32xf32>
    %85 = arith.mulf %78, %84 : vector<1x8x32xf32>
    "tpu.trace_start"() <{level = 10 : i32, message = "bqh,bkh->bqk"}> : () -> ()
    %cst_41 = arith.constant dense<0.000000e+00> : vector<1x8x8xf32>
    %86 = tpu.matmul %85, %83, %cst_41 {dimension_numbers = #tpu.dot_dimension_numbers<[2], [2], [1], [1], [0, 0, 0, 1, 1, 1], [0], [0]>} : vector<1x8x32xf32>, vector<1x8x32xf32>, vector<1x8x8xf32> -> vector<1x8x8xf32>
    "tpu.trace_stop"() : () -> ()
    %cst_42 = arith.constant dense<0xFF800000> : vector<1x8xf32>
    %87 = vector.multi_reduction <maximumf>, %86, %cst_42 [2] : vector<1x8x8xf32> to vector<1x8xf32>
    %cst_43 = arith.constant 0xFF800000 : f32
    %88 = vector.broadcast %cst_43 : f32 to vector<1x8xf32>
    %89 = arith.maximumf %88, %87 : vector<1x8xf32>
    %90 = vector.shape_cast %89 : vector<1x8xf32> to vector<1x8x1xf32>
    %91 = vector.broadcast %90 : vector<1x8x1xf32> to vector<1x8x8xf32>
    %92 = arith.subf %86, %91 : vector<1x8x8xf32>
    %93 = math.exp %92 : vector<1x8x8xf32>
    %cst_44 = arith.constant dense<0.000000e+00> : vector<1x8xf32>
    %94 = vector.multi_reduction <add>, %93, %cst_44 [2] : vector<1x8x8xf32> to vector<1x8xf32>
    %95 = vector.shape_cast %94 : vector<1x8xf32> to vector<1x8x1xf32>
    %96 = vector.broadcast %95 : vector<1x8x1xf32> to vector<1x8x8xf32>
    %97 = arith.divf %93, %96 : vector<1x8x8xf32>
    "tpu.trace_start"() <{level = 10 : i32, message = "bqk,bkh->bqh"}> : () -> ()
    %cst_45 = arith.constant dense<0.000000e+00> : vector<1x8x32xf32>
    %98 = tpu.matmul %97, %49, %cst_45 {dimension_numbers = #tpu.dot_dimension_numbers<[2], [1], [1], [2], [0, 0, 0, 1, 1, 2], [0], [0]>} : vector<1x8x8xf32>, vector<1x8x32xf32>, vector<1x8x32xf32> -> vector<1x8x32xf32>
    "tpu.trace_stop"() : () -> ()
    %99 = vector.shape_cast %38 : vector<8x32xf32> to vector<1x8x32xf32>
    %100 = arith.addf %98, %99 : vector<1x8x32xf32>
    %c0_46 = arith.constant 0 : index
    %c0_47 = arith.constant 0 : index
    %101 = vector.load %arg14[%c0_46, %c0_47] : memref<1x32xf32, #tpu.memory_space<vmem>>, vector<1x32xf32>
    %c0_48 = arith.constant 0 : index
    %c0_49 = arith.constant 0 : index
    %102 = vector.load %arg15[%c0_48, %c0_49] : memref<1x32xf32, #tpu.memory_space<vmem>>, vector<1x32xf32>
    %cst_50 = arith.constant dense<0.000000e+00> : vector<1x8xf32>
    %103 = vector.multi_reduction <add>, %100, %cst_50 [2] : vector<1x8x32xf32> to vector<1x8xf32>
    %104 = vector.shape_cast %103 : vector<1x8xf32> to vector<1x8x1xf32>
    %cst_51 = arith.constant 3.200000e+01 : f32
    %105 = vector.broadcast %cst_51 : f32 to vector<1x8x1xf32>
    %106 = arith.divf %104, %105 : vector<1x8x1xf32>
    %107 = arith.mulf %100, %100 : vector<1x8x32xf32>
    %cst_52 = arith.constant dense<0.000000e+00> : vector<1x8xf32>
    %108 = vector.multi_reduction <add>, %107, %cst_52 [2] : vector<1x8x32xf32> to vector<1x8xf32>
    %109 = vector.shape_cast %108 : vector<1x8xf32> to vector<1x8x1xf32>
    %cst_53 = arith.constant 3.200000e+01 : f32
    %110 = vector.broadcast %cst_53 : f32 to vector<1x8x1xf32>
    %111 = arith.divf %109, %110 : vector<1x8x1xf32>
    %112 = arith.mulf %106, %106 : vector<1x8x1xf32>
    %113 = arith.subf %111, %112 : vector<1x8x1xf32>
    %114 = vector.broadcast %106 : vector<1x8x1xf32> to vector<1x8x32xf32>
    %115 = arith.subf %100, %114 : vector<1x8x32xf32>
    %cst_54 = arith.constant 9.99999974E-6 : f32
    %116 = vector.broadcast %cst_54 : f32 to vector<1x8x1xf32>
    %117 = arith.addf %113, %116 : vector<1x8x1xf32>
    %118 = math.rsqrt %117 : vector<1x8x1xf32>
    %119 = vector.broadcast %118 : vector<1x8x1xf32> to vector<1x8x32xf32>
    %120 = arith.mulf %115, %119 : vector<1x8x32xf32>
    %121 = vector.shape_cast %101 : vector<1x32xf32> to vector<1x1x32xf32>
    %122 = vector.broadcast %121 : vector<1x1x32xf32> to vector<1x8x32xf32>
    %123 = arith.mulf %120, %122 : vector<1x8x32xf32>
    %124 = vector.shape_cast %102 : vector<1x32xf32> to vector<1x1x32xf32>
    %125 = vector.broadcast %124 : vector<1x1x32xf32> to vector<1x8x32xf32>
    %126 = arith.addf %123, %125 : vector<1x8x32xf32>
    %127 = arith.addf %126, %0 : vector<1x8x32xf32>
    %c0_55 = arith.constant 0 : index
    %c0_56 = arith.constant 0 : index
    %128 = vector.load %arg16[%c0_55, %c0_56] : memref<1x32xf32, #tpu.memory_space<vmem>>, vector<1x32xf32>
    %c0_57 = arith.constant 0 : index
    %c0_58 = arith.constant 0 : index
    %129 = vector.load %arg17[%c0_57, %c0_58] : memref<1x32xf32, #tpu.memory_space<vmem>>, vector<1x32xf32>
    %cst_59 = arith.constant dense<0.000000e+00> : vector<1x8xf32>
    %130 = vector.multi_reduction <add>, %127, %cst_59 [2] : vector<1x8x32xf32> to vector<1x8xf32>
    %131 = vector.shape_cast %130 : vector<1x8xf32> to vector<1x8x1xf32>
    %cst_60 = arith.constant 3.200000e+01 : f32
    %132 = vector.broadcast %cst_60 : f32 to vector<1x8x1xf32>
    %133 = arith.divf %131, %132 : vector<1x8x1xf32>
    %134 = arith.mulf %127, %127 : vector<1x8x32xf32>
    %cst_61 = arith.constant dense<0.000000e+00> : vector<1x8xf32>
    %135 = vector.multi_reduction <add>, %134, %cst_61 [2] : vector<1x8x32xf32> to vector<1x8xf32>
    %136 = vector.shape_cast %135 : vector<1x8xf32> to vector<1x8x1xf32>
    %cst_62 = arith.constant 3.200000e+01 : f32
    %137 = vector.broadcast %cst_62 : f32 to vector<1x8x1xf32>
    %138 = arith.divf %136, %137 : vector<1x8x1xf32>
    %139 = arith.mulf %133, %133 : vector<1x8x1xf32>
    %140 = arith.subf %138, %139 : vector<1x8x1xf32>
    %141 = vector.broadcast %133 : vector<1x8x1xf32> to vector<1x8x32xf32>
    %142 = arith.subf %127, %141 : vector<1x8x32xf32>
    %cst_63 = arith.constant 9.99999974E-6 : f32
    %143 = vector.broadcast %cst_63 : f32 to vector<1x8x1xf32>
    %144 = arith.addf %140, %143 : vector<1x8x1xf32>
    %145 = math.rsqrt %144 : vector<1x8x1xf32>
    %146 = vector.broadcast %145 : vector<1x8x1xf32> to vector<1x8x32xf32>
    %147 = arith.mulf %142, %146 : vector<1x8x32xf32>
    %148 = vector.shape_cast %128 : vector<1x32xf32> to vector<1x1x32xf32>
    %149 = vector.broadcast %148 : vector<1x1x32xf32> to vector<1x8x32xf32>
    %150 = arith.mulf %147, %149 : vector<1x8x32xf32>
    %151 = vector.shape_cast %129 : vector<1x32xf32> to vector<1x1x32xf32>
    %152 = vector.broadcast %151 : vector<1x1x32xf32> to vector<1x8x32xf32>
    %153 = arith.addf %150, %152 : vector<1x8x32xf32>
    %c0_64 = arith.constant 0 : index
    %c0_65 = arith.constant 0 : index
    %c0_66 = arith.constant 0 : index
    %154 = vector.load %arg18[%c0_64, %c0_65, %c0_66] : memref<1x8x32xf32, #tpu.memory_space<vmem>>, vector<1x8x32xf32>
    tpu.vector_store %arg18[%c0_64, %c0_65, %c0_66], %153 {strides = array<i32>} : memref<1x8x32xf32, #tpu.memory_space<vmem>>, vector<1x8x32xf32>,
    %c0_67 = arith.constant 0 : index
    %c0_68 = arith.constant 0 : index
    %c0_69 = arith.constant 0 : index
    %155 = vector.load %arg19[%c0_67, %c0_68, %c0_69] : memref<1x8x8xf32, #tpu.memory_space<vmem>>, vector<1x8x8xf32>
    tpu.vector_store %arg19[%c0_67, %c0_68, %c0_69], %86 {strides = array<i32>} : memref<1x8x8xf32, #tpu.memory_space<vmem>>, vector<1x8x8xf32>,
    return
  }
  func.func @transform_0(%arg0: i32) -> (i32, i32, i32) {
    %c0_i32 = arith.constant 0 : i32
    %c0_i32_0 = arith.constant 0 : i32
    %c0_i32_1 = arith.constant 0 : i32
    return %arg0, %c0_i32, %c0_i32_0 : i32, i32, i32
  }
  func.func @transform_1(%arg0: i32) -> (i32, i32) {
    %c0_i32 = arith.constant 0 : i32
    %c0_i32_0 = arith.constant 0 : i32
    %c0_i32_1 = arith.constant 0 : i32
    return %c0_i32, %c0_i32_0 : i32, i32
  }
  func.func @transform_2(%arg0: i32) -> (i32, i32) {
    %c0_i32 = arith.constant 0 : i32
    %c0_i32_0 = arith.constant 0 : i32
    %c0_i32_1 = arith.constant 0 : i32
    return %c0_i32, %c0_i32_0 : i32, i32
  }
  func.func @transform_3(%arg0: i32) -> (i32, i32) {
    %c0_i32 = arith.constant 0 : i32
    %c0_i32_0 = arith.constant 0 : i32
    %c0_i32_1 = arith.constant 0 : i32
    return %c0_i32, %c0_i32_0 : i32, i32
  }
  func.func @transform_4(%arg0: i32) -> (i32, i32) {
    %c0_i32 = arith.constant 0 : i32
    %c0_i32_0 = arith.constant 0 : i32
    %c0_i32_1 = arith.constant 0 : i32
    return %c0_i32, %c0_i32_0 : i32, i32
  }
  func.func @transform_5(%arg0: i32) -> (i32, i32) {
    %c0_i32 = arith.constant 0 : i32
    %c0_i32_0 = arith.constant 0 : i32
    %c0_i32_1 = arith.constant 0 : i32
    return %c0_i32, %c0_i32_0 : i32, i32
  }
  func.func @transform_6(%arg0: i32) -> (i32, i32) {
    %c0_i32 = arith.constant 0 : i32
    %c0_i32_0 = arith.constant 0 : i32
    %c0_i32_1 = arith.constant 0 : i32
    return %c0_i32, %c0_i32_0 : i32, i32
  }
  func.func @transform_7(%arg0: i32) -> (i32, i32) {
    %c0_i32 = arith.constant 0 : i32
    %c0_i32_0 = arith.constant 0 : i32
    %c0_i32_1 = arith.constant 0 : i32
    return %c0_i32, %c0_i32_0 : i32, i32
  }
  func.func @transform_8(%arg0: i32) -> (i32, i32) {
    %c0_i32 = arith.constant 0 : i32
    %c0_i32_0 = arith.constant 0 : i32
    %c0_i32_1 = arith.constant 0 : i32
    return %c0_i32, %c0_i32_0 : i32, i32
  }
  func.func @transform_9(%arg0: i32) -> (i32, i32) {
    %c0_i32 = arith.constant 0 : i32
    %c0_i32_0 = arith.constant 0 : i32
    %c0_i32_1 = arith.constant 0 : i32
    return %c0_i32, %c0_i32_0 : i32, i32
  }
  func.func @transform_10(%arg0: i32) -> (i32, i32) {
    %c0_i32 = arith.constant 0 : i32
    %c0_i32_0 = arith.constant 0 : i32
    %c0_i32_1 = arith.constant 0 : i32
    return %c0_i32, %c0_i32_0 : i32, i32
  }
  func.func @transform_11(%arg0: i32) -> (i32, i32) {
    %c0_i32 = arith.constant 0 : i32
    %c0_i32_0 = arith.constant 0 : i32
    %c0_i32_1 = arith.constant 0 : i32
    return %c0_i32, %c0_i32_0 : i32, i32
  }
  func.func @transform_12(%arg0: i32) -> (i32, i32) {
    %c0_i32 = arith.constant 0 : i32
    %c0_i32_0 = arith.constant 0 : i32
    %c0_i32_1 = arith.constant 0 : i32
    return %c0_i32, %c0_i32_0 : i32, i32
  }
  func.func @transform_13(%arg0: i32) -> (i32, i32) {
    %c0_i32 = arith.constant 0 : i32
    %c0_i32_0 = arith.constant 0 : i32
    %c0_i32_1 = arith.constant 0 : i32
    return %c0_i32, %c0_i32_0 : i32, i32
  }
  func.func @transform_14(%arg0: i32) -> (i32, i32) {
    %c0_i32 = arith.constant 0 : i32
    %c0_i32_0 = arith.constant 0 : i32
    %c0_i32_1 = arith.constant 0 : i32
    return %c0_i32, %c0_i32_0 : i32, i32
  }
  func.func @transform_15(%arg0: i32) -> (i32, i32) {
    %c0_i32 = arith.constant 0 : i32
    %c0_i32_0 = arith.constant 0 : i32
    %c0_i32_1 = arith.constant 0 : i32
    return %c0_i32, %c0_i32_0 : i32, i32
  }
  func.func @transform_16(%arg0: i32) -> (i32, i32) {
    %c0_i32 = arith.constant 0 : i32
    %c0_i32_0 = arith.constant 0 : i32
    %c0_i32_1 = arith.constant 0 : i32
    return %c0_i32, %c0_i32_0 : i32, i32
  }
  func.func @transform_17(%arg0: i32) -> (i32, i32, i32) {
    %c0_i32 = arith.constant 0 : i32
    %c0_i32_0 = arith.constant 0 : i32
    %c0_i32_1 = arith.constant 0 : i32
    return %arg0, %c0_i32, %c0_i32_0 : i32, i32, i32
  }
  func.func @transform_18(%arg0: i32) -> (i32, i32, i32) {
    %c0_i32 = arith.constant 0 : i32
    %c0_i32_0 = arith.constant 0 : i32
    %c0_i32_1 = arith.constant 0 : i32
    return %arg0, %c0_i32, %c0_i32_0 : i32, i32, i32
  }
}

</mosaic_0001>

<bundles_post_ra>
// kernel: tpu_custom_call.1
= control target key start
LH: loop header
LB: loop body
LE: loop exit
PB: predicated region body
PF: predicated region fallthrough
CT: control target
= control target key end

     0   :  { %s2332_s0 = inlined_call_operand.vmem [shape: f32[2,8,32], index: 0, kind: input, shape index: {}]   ;;  %s2333_s1 = inlined_call_operand.vmem [shape: f32[32,128], index: 1, kind: input, shape index: {}]   ;;  %s2334_s2 = inlined_call_operand.vmem [shape: f32[1,128], index: 2, kind: input, shape index: {}]   ;;  %s2335_s3 = inlined_call_operand.vmem [shape: f32[128,32], index: 3, kind: input, shape index: {}]   ;;  %s2336_s4 = inlined_call_operand.vmem [shape: f32[1,32], index: 4, kind: input, shape index: {}]   ;;  %s2337_s5 = inlined_call_operand.vmem [shape: f32[1,32], index: 5, kind: input, shape index: {}]   ;;  %s2338_s6 = inlined_call_operand.vmem [shape: f32[1,32], index: 6, kind: input, shape index: {}]   ;;  %s2339_s7 = inlined_call_operand.vmem [shape: f32[32,96], index: 7, kind: input, shape index: {}]   ;;  %s2340_s8 = inlined_call_operand.vmem [shape: f32[1,96], index: 8, kind: input, shape index: {}]   ;;  %s2341_s9 = inlined_call_operand.vmem [shape: f32[32,64], index: 9, kind: input, shape index: {}]   ;;  %s2342_s10 = inlined_call_operand.vmem [shape: f32[32,2], index: 10, kind: input, shape index: {}]   ;;  %s2343_s11 = inlined_call_operand.vmem [shape: f32[1,2], index: 11, kind: input, shape index: {}]   ;;  %s2344_s12 = inlined_call_operand.vmem [shape: f32[32,2], index: 12, kind: input, shape index: {}]   ;;  %s2345_s13 = inlined_call_operand.vmem [shape: f32[1,32], index: 13, kind: input, shape index: {}]   ;;  %s2346_s14 = inlined_call_operand.vmem [shape: f32[1,32], index: 14, kind: input, shape index: {}]   ;;  %s2347_s15 = inlined_call_operand.vmem [shape: f32[1,32], index: 15, kind: input, shape index: {}]   ;;  %s2348_s16 = inlined_call_operand.vmem [shape: f32[1,32], index: 16, kind: input, shape index: {}]   ;;  %s2349_s17 = inlined_call_operand.hbm [shape: f32[2,8,32], index: 17, kind: output, shape index: {0}]   ;;  %s2350_s18 = inlined_call_operand.hbm [shape: f32[2,8,8], index: 18, kind: output, shape index: {1}]  }
   0x1   :  { %2359 = sst [smem:[#allocation12_spill]] %s2332_s0 }
   0x2   :  { %2360 = sst [smem:[#allocation13_spill]] %s2333_s1 }
   0x3   :  { %2361 = sst [smem:[#allocation14_spill]] %s2334_s2 }
   0x4   :  { %2362 = sst [smem:[#allocation15_spill]] %s2335_s3 }
   0x5   :  { %2363 = sst [smem:[#allocation16_spill]] %s2336_s4 }
   0x6   :  { %24 = vsyncpa [#allocation3], 0 }
   0x7   :  { %26 = vsyncpa [#allocation3 + $0x1], 0 }
   0x8   :  { %27 = vsyncpa [#allocation5], 0 }
   0x9   :  { %29 = vsyncpa [#allocation5 + $0x1], 0  ;;  %s1989_s27 = smov 0   ;;  %s1991_s28 = smov 0  }
   0xa   :  { %s1993_s29 = smov 0   ;;  %s1995_s30 = smov 0  }
   0xb LB: > { %2364 = sst [smem:[#allocation8_spill]] %s1879_s29  ;;  %s2010_s0 = sadd.s32 4294967295, %s1883_s30   ;;  %s1883_s30 = sphi %s1995_s30, %s2378_s30   ;;  %s1879_s29 = sphi %s1993_s29, %s2380_s29   ;;  %s1875_s28 = sphi %s1991_s28, %s2382_s28   ;;  %s1871_s27 = sphi %s1989_s27, %s2381_s27  }
   0xc   : > { %s1491_s19 = sadd.s32 4294967294, %s1883_s30   ;;  %s2014_s1 = sadd.s32 1, %s1883_s30  }
   0xd   : > { %2365 = sst [smem:[#allocation9_spill]] %s2014_s1  ;;  %s404_s20 = sadd.s32 1, %s1879_s29 }
   0xe   : > { %s401_s21 = ssub.s32 %s1883_s30, %s2014_s1  ;;  %p414_p0 = scmp.ne.s32.totalorder %s1879_s29, %s1875_s28 }
   0xf   : > { %p402_p1 = scmp.eq.s32.totalorder %s401_s21, 0  ;;  %p415_p2 = scmp.eq.s32.totalorder %s2010_s0, 1 }
  0x10   : > { %p420_p3 = scmp.ne.s32.totalorder %s1875_s28, %s1871_s27  ;;  %p421_p4 = scmp.eq.s32.totalorder %s1491_s19, 1 }
  0x11   : > { %s2025_s22 = scalar_select %p402_p1, %s1879_s29, %s404_s20  }
  0x12   : > { %p2027_p5 = por %p415_p2, %p414_p0  ;;  %p2031_p6 = por %p421_p4, %p420_p3 }
  0x13   : > { %2366 = sst [smem:[#allocation10_spill]] %s2025_s22  ;;  %p1494_p7 = scmp.ge.s32.totalorder %s1883_s30, 1 }
  0x14   : > { %s2368_s23 = scalar_select %p2031_p6, 1, 0 }
  0x15   : > { %p520_p8 = scmp.lt.s32.totalorder %s1883_s30, 3 }
  0x16   : > { %2369 = sst [smem:[#allocation11_spill]] %s2368_s23 }
  0x17   : > { %p521_p9 = pnand %p1494_p7, %p520_p8 }
  0x18   : > { %s2370_s26 = sld [smem:[#allocation13_spill]] (!%p521_p9)  ;;  %v1885_v3 = vmov (!%p521_p9), 0.0|0.0   ;;  %vm1886_vm0 = vmmov (!%p521_p9), 0   ;;  %v1887_v6 = vmov (!%p521_p9), 0.0   ;;  %p578_p10 = scmp.lt.s32.totalorder (!%p521_p9), %s2010_s0, 1  ;;  %vm583_vm1 = vcmask (!%p521_p9), 261120  }
  0x19   : > { %524 = sbr.rel (%p521_p9) target bundleno = 2086 (0x826), region = 88  ;;  %1667 = vmatprep.subr.bf16.mxu0 (!%p521_p9), %v1885_v3  ;;  %1575 = vmatprep.mubr.msk.f32.mxu0 (!%p521_p9), %vm1886_vm0, %v1887_v6  ;;  %s2371_s3 = sld [smem:[#allocation15_spill]] (!%p521_p9)  ;;  %v790_v43 = vld [vmem:[%s2339_s7] sm:$0xff] (!%p521_p9)  ;;  %v791_v44 = vld [vmem:[%s2339_s7 + $0x8] sm:$0xff] (!%p521_p9)  ;;  %v792_v45 = vld [vmem:[%s2339_s7 + $0x10] sm:$0xff] (!%p521_p9)  ;;  %vm1214_vm2 = vcmask (!%p521_p9), 64512  }
  0x1a   : > { %1673 = vmatprep.subr.bf16.mxu1 (!%p521_p9), %v1885_v3  ;;  %1610 = vmatprep.mubr.msk.f32.mxu1 (!%p521_p9), %vm1886_vm0, %v1887_v6  ;;  %v1698_v46 = vpack.c.bf16 (!%p521_p9), %v791_v44, %v790_v43  ;;  %v793_v47 = vld [vmem:[%s2339_s7 + $0x18] sm:$0xff] (!%p521_p9)  ;;  %v1499_v63 = vld [vmem:[%s2337_s5] ss:$0 sm:$0xff] (!%p521_p9)  ;;  %s2374_s4 = sld [smem:[#allocation16_spill]] (!%p521_p9)  ;;  %s1891_s21 = smov (!%p521_p9), 64  }
  0x1b   : > { %v1701_v48 = vpack.c.bf16 (!%p521_p9), %v793_v47, %v792_v45 }
  0x1e   : > { %v593_v0 = vld [vmem:[%s2370_s26] sm:$0xff] (!%p521_p9)  ;;  %v594_v1 = vld [vmem:[%s2370_s26 + $0x8] sm:$0xff] (!%p521_p9)  ;;  %v595_v2 = vld [vmem:[%s2370_s26 + $0x10] sm:$0xff] (!%p521_p9) }
  0x1f   : > { %v1668_v4 = vpack.c.bf16 (!%p521_p9), %v594_v1, %v593_v0  ;;  %v596_v5 = vld [vmem:[%s2370_s26 + $0x18] sm:$0xff] (!%p521_p9)  ;;  %v672_v7 = vld [vmem:[%s2371_s3] sm:$0xff] (!%p521_p9)  ;;  %v673_v8 = vld [vmem:[%s2371_s3 + $0x8] sm:$0xff] (!%p521_p9)  ;;  %s2372_s26 = sld [smem:[#allocation12_spill]] (!%p521_p9) }
  0x20   : > { %v1674_v9 = vpack.c.bf16 %v673_v8, %v672_v7  ;;  %v674_v10 = vld [vmem:[%s2371_s3 + $0x10] sm:$0xff]  ;;  %v675_v11 = vld [vmem:[%s2371_s3 + $0x18] sm:$0xff]  ;;  %v1671_v12 = vpack.c.bf16 %v596_v5, %v595_v2  ;;  %s579_s24 = scalar_select %p578_p10, %s2010_s0, 1  ;;  %v676_v14 = vld [vmem:[%s2371_s3 + $0x20] sm:$0xff] }
  0x21   : > { %1669 = vmatpush3.bf16.msra.mxu0 %v1668_v4  ;;  %v1677_v13 = vpack.c.bf16 %v675_v11, %v674_v10  ;;  %v677_v15 = vld [vmem:[%s2371_s3 + $0x28] sm:$0xff]  ;;  %v678_v20 = vld [vmem:[%s2371_s3 + $0x30] sm:$0xff]  ;;  %v679_v21 = vld [vmem:[%s2371_s3 + $0x38] sm:$0xff] }
  0x22   : > { %1670 = vmatprep.subr.bf16.mxu0 %v1885_v3  ;;  %1675 = vmatpush3.bf16.msra.mxu1 %v1674_v9  ;;  %s1497_s25 = sshll.u32 %s579_s24, 3  ;;  %v1680_v18 = vpack.c.bf16 %v677_v15, %v676_v14  ;;  %v1683_v23 = vpack.c.bf16 %v679_v21, %v678_v20  ;;  %v680_v25 = vld [vmem:[%s2371_s3 + $0x40] sm:$0xff]  ;;  %v681_v26 = vld [vmem:[%s2371_s3 + $0x48] sm:$0xff]  ;;  %v682_v30 = vld [vmem:[%s2371_s3 + $0x50] sm:$0xff]  ;;  %s2373_s24 = sld [smem:[#allocation14_spill]] }
  0x23   : > { %1676 = vmatprep.subr.bf16.mxu1 %v1885_v3  ;;  %v1686_v28 = vpack.c.bf16 %v681_v26, %v680_v25  ;;  %v683_v31 = vld [vmem:[%s2371_s3 + $0x58] sm:$0xff]  ;;  %v684_v35 = vld [vmem:[%s2371_s3 + $0x60] sm:$0xff]  ;;  %v685_v36 = vld [vmem:[%s2371_s3 + $0x68] sm:$0xff] }
  0x24   : > { %v1689_v33 = vpack.c.bf16 %v683_v31, %v682_v30  ;;  %v1692_v37 = vpack.c.bf16 %v685_v36, %v684_v35  ;;  %v686_v38 = vld [vmem:[%s2371_s3 + $0x70] sm:$0xff]  ;;  %v687_v39 = vld [vmem:[%s2371_s3 + $0x78] sm:$0xff]  ;;  %v874_v1 = vld [vmem:[%s2341_s9] sm:$0xff]  ;;  %v1888_v31 = vmov 1  }
  0x25   : > { %s581_s23 = scalar_lea.vmem %s2372_s26, %s1497_s25  ;;  %1672 = vmatpush3.bf16.msra.mxu0 %v1671_v12  ;;  %v1695_v40 = vpack.c.bf16 %v687_v39, %v686_v38  ;;  %v875_v2 = vld [vmem:[%s2341_s9 + $0x8] sm:$0xff]  ;;  %v1500_v4 = vld [vmem:[%s2338_s6] ss:$0 sm:$0xff]  ;;  %v876_v9 = vld [vmem:[%s2341_s9 + $0x10] sm:$0xff]  ;;  %1772 = vset.pattern.permute.xlu1 %v1888_v31  ;;  %s1890_s26 = smov 96  }
  0x26   : > { %v2080_v16 = vld [vmem:[%s581_s23] sm:$0xff]  ;;  %1678 = vmatpush3.bf16.msra.mxu1 %v1677_v13  ;;  %1697 = vmatprep.subr.bf16.mxu0 %v1885_v3  ;;  %v1704_v7 = vpack.c.bf16 %v875_v2, %v874_v1  ;;  %v877_v10 = vld [vmem:[%s2341_s9 + $0x18] sm:$0xff]  ;;  %v952_v13 = vld [vmem:[%s2342_s10 + $0x8] sm:$0xff]  ;;  %s2224_s25 = sand.u32 1, %s1875_s28   ;;  %s2358_s23 = sshll.u32 %s2010_s0, 7 }
  0x27   : > { %v584_v17 = vsel %vm583_vm1, %v2080_v16, 0.0  ;;  %1679 = vmatprep.subr.bf16.mxu1 %v1885_v3  ;;  %v765_v41 = vmul.f32 %v2080_v16, %v2080_v16  ;;  %v1707_v11 = vpack.c.bf16 %v877_v10, %v876_v9  ;;  %v951_v12 = vld [vmem:[%s2342_s10] sm:$0xff]  ;;  %v953_v20 = vld [vmem:[%s2342_s10 + $0x10] sm:$0xff]  ;;  %v954_v21 = vld [vmem:[%s2342_s10 + $0x18] sm:$0xff]  ;;  %1774 = vset.pattern.permute.xlu0 %v1888_v31  ;;  %s2357_s29 = sshll.u32 %s2224_s25, 3  ;;  %s1374_s19 = scalar_lea.sflag [#allocation5], %s2224_s25 }
  0x28   : > { %v585_v19 = vrot.slane %v584_v17, 4  ;;  %761 = vadd.xlane.f32.xlu0 %v584_v17  ;;  %v597_v49 = vld [vmem:[%s2373_s24] sm:$0x1]  ;;  %v1034_v26 = vld [vmem:[%s2344_s12 + $0x10] sm:$0xff]  ;;  %s2230_s1 = scalar_lea.vmem [#allocation4], %s2357_s29  ;;  %s2254_s24 = scalar_lea.hbm %s2350_s18, %s2358_s23 }
  0x29   : > { %v766_v42 = vsel %vm583_vm1, %v765_v41, 0.0  ;;  %v688_v14 = vld [vmem:[%s2374_s4] sm:$0x1]  ;;  %s1400_s22 = sshll.u32 %s2230_s1, 4  ;;  %s1892_s29 = smov [#allocation4]   ;;  %s1401_s22 = int_to_ptr.vmem [resolvable:$true] %s1400_s22 }
  0x2a   : > { %v586_v22 = vadd.f32 %v585_v19, %v584_v17  ;;  %1681 = vmatpush3.bf16.msra.mxu1 %v1680_v18  ;;  %v1710_v17 = vpack.c.bf16 %v952_v13, %v951_v12  ;;  %s1789_s20 = scalar_lea.vmem %s1401_s22, 128  ;;  %s1793_s3 = sshll.u32 %s1892_s29, 4  ;;  %s1794_s3 = int_to_ptr.vmem [resolvable:$false] %s1793_s3 }
  0x2b   : > { %1682 = vmatprep.subr.bf16.mxu1 %v1885_v3  ;;  %p1790_p11 = scmp.ne.s32.totalorder %s1401_s22, %s1789_s20  ;;  %s1795_s4 = scalar_lea.vmem %s1794_s3, 256 }
  0x2c   : > { %v587_v24 = vrot.slane %v586_v22, 2  ;;  %767 = vadd.xlane.f32.xlu0 %v766_v42  ;;  %p1796_p0 = scmp.lt.s32.totalorder %s1401_s22, %s1794_s3  ;;  %p1797_p1 = scmp.lt.s32.totalorder %s1795_s4, %s1789_s20 }
  0x2d   : > { %p1791_p12 = pnand %p1790_p11, %p2027_p5 }
  0x2e   : > { %v588_v27 = vadd.f32 %v587_v24, %v586_v22  ;;  %1684 = vmatpush3.bf16.msra.mxu1 %v1683_v23  ;;  %v1713_v22 = vpack.c.bf16 %v954_v21, %v953_v20  ;;  %v1032_v23 = vld [vmem:[%s2344_s12] sm:$0xff]  ;;  %v1033_v24 = vld [vmem:[%s2344_s12 + $0x8] sm:$0xff]  ;;  %p1798_p2 = por %p1797_p1, %p1796_p0 }
  0x2f   : > { %1685 = vmatprep.subr.bf16.mxu1 %v1885_v3  ;;  %v1716_v25 = vpack.c.bf16 %v1033_v24, %v1032_v23  ;;  %p1792_p13 = pneg %p1791_p12 }
  0x30   : > { %v589_v29 = vrot.slane %v588_v27, 1 }
  0x31   : > { %p1799_p3 = pnand %p1798_p2, %p1792_p13 }
  0x32   : > { %v590_v32 = vadd.f32 %v589_v29, %v588_v27  ;;  %1687 = vmatpush3.bf16.msra.mxu1 %v1686_v28  ;;  %v1035_v27 = vld [vmem:[%s2344_s12 + $0x18] sm:$0xff] }
  0x33   : > { %1688 = vmatprep.subr.bf16.mxu1 %v1885_v3  ;;  %v1719_v28 = vpack.c.bf16 %v1035_v27, %v1034_v26  ;;  %v1511_v26 = vld [vmem:[%s2345_s13] ss:$0 sm:$0xff] }
  0x34   : > { %v592_v34 = vmul.f32 0.125, %v590_v32  ;;  %v1106_v32 = vlaneseq }
  0x36   : > { %1576 = vmatmul.mubr.msk.f32.vlgmr.msra.gmra.mrb[0].mxu0 %vm583_vm1, %v592_v34  ;;  %1690 = vmatpush3.bf16.msra.mxu1 %v1689_v33  ;;  %v1107_v33 = vshrl.u32 %v1106_v32, 7 }
  0x37   : > { %1621 = vmatprep.mubr.msk.f32.mxu0 %vm1886_vm0, %v1887_v6  ;;  %1691 = vmatprep.subr.bf16.mxu1 %v1885_v3 }
  0x38   : > { %1699 = vmatpush3.bf16.msra.mxu0 %v1698_v46  ;;  %v1108_v34 = vsub.s32 0, %v1107_v33 }
  0x39   : > { %1700 = vmatprep.subr.bf16.mxu0 %v1885_v3 }
  0x3a   : > { %1693 = vmatpush3.bf16.msra.mxu1 %v1692_v37 }
  0x3b   : > { %1694 = vmatprep.subr.bf16.mxu1 %v1885_v3 }
  0x3c   : > { %1702 = vmatpush3.bf16.msra.mxu0 %v1701_v48 }
  0x3d   : > { %1703 = vmatprep.subr.bf16.mxu0 %v1885_v3 }
  0x3e   : > { %1696 = vmatpush3.bf16.msra.mxu1 %v1695_v40 }
  0x3f   : > { %1657 = vmatprep.subr.mxu1 %v1887_v6 }
  0xb5   : > { %v762_v54 = vpop.xlane.xlu0 %761 }
  0xb6   : > { %v764_v55 = vmul.f32 0.03125, %v762_v54 }
  0xb8   : > { %v770_v56 = vmul.f32 %v764_v55, %v764_v55  ;;  %v772_v61 = vsub.f32 %v2080_v16, %v764_v55 }
  0xb9   : > { %v768_v57 = vpop.xlane.xlu0 %767 }
  0xba   : > { %v769_v58 = vmul.f32 0.03125, %v768_v57 }
  0xbc   : > { %v771_v59 = vsub.f32 %v769_v58, %v770_v56 }
  0xbe   : > { %v773_v60 = vadd.f32 1e-05, %v771_v59 }
  0xc0   : > { %1775 = vrsqrt.f32 %v773_v60 }
  0xca   : > { %v1776_v62 = vpop.eup %1775 }
  0xcb   : > { %v775_v0 = vmul.f32 %v1776_v62, %v772_v61 }
  0xcd   : > { %v782_v5 = vmul.f32 %v1499_v63, %v775_v0 }
  0xcf   : > { %v2160_v8 = vadd.f32 %v1500_v4, %v782_v5 }
  0xd1   : > { %1622 = vmatmul.mubr.msk.f32.vlgmr.msra.gmra.mrb[2].mxu0 %vm583_vm1, %v2160_v8 }
  0xd2   : > { %1705 = vmatpush3.bf16.msra.mxu0 %v1704_v7  ;;  %1632 = vmatprep.mubr.msk.f32.mxu0 %vm1886_vm0, %v1887_v6 }
  0xd3   : > { %1706 = vmatprep.subr.bf16.mxu0 %v1885_v3 }
  0xd6   : > { %1708 = vmatpush3.bf16.msra.mxu0 %v1707_v11 }
  0xd7   : > { %1709 = vmatprep.subr.bf16.mxu0 %v1885_v3 }
 0x109   : > { %v667_v50 = vpop.f32.mrb[0].mxu0 }
 0x10a   : > { %v668_v51 = vadd.f32 %v667_v50, %v597_v49  ;;  %v1577_v52 = vpop.f32.mrb[1].mxu0  ;;  %v1889_v49 = vmov 0   ;;  %v1501_v50 = vld [vmem:[%s2340_s8] ss:$0 sm:$0xff] }
 0x10c   : > { %v671_v53 = vmax.f32 %v668_v51, 0.0 }
 0x10e   : > { %1611 = vmatmul.mubr.f32.vlgmr.msra.gmra.mrb[0].mxu1 %v671_v53 }
 0x10f   : > { %1659 = vmatprep.mubr.msk.f32.mxu1 %vm1886_vm0, %v1887_v6 }
 0x1a4   : > { %v870_v29 = vpop.f32.mrb[2].mxu0 }
 0x1a5   : > { %v1623_v30 = vpop.f32.mrb[3].mxu0  ;;  %v871_v51 = vadd.f32 %v1501_v50, %v870_v29 }
 0x1e1   : > { %v755_v15 = vpop.f32.mrb[0].mxu1 }
 0x1e2   : > { %v756_v18 = vadd.f32 %v755_v15, %v688_v14  ;;  %v1612_v19 = vpop.f32.mrb[1].mxu1 }
 0x1e4   : > { %1633 = vmatmul.mubr.msk.f32.vlgmr.msra.gmra.mrb[4].mxu0 %vm583_vm1, %v756_v18 }
 0x1e5   : > { %1711 = vmatpush3.bf16.msra.mxu0 %v1710_v17  ;;  %1643 = vmatprep.mubr.msk.f32.mxu0 %vm1886_vm0, %v1887_v6 }
 0x1e6   : > { %1712 = vmatprep.subr.bf16.mxu0 %v1885_v3 }
 0x1e9   : > { %1714 = vmatpush3.bf16.msra.mxu0 %v1713_v22 }
 0x1ea   : > { %1715 = vmatprep.subr.bf16.mxu0 %v1885_v3 }
 0x1ec   : > { %1644 = vmatmul.mubr.msk.f32.vlgmr.msra.gmra.mrb[6].mxu0 %vm583_vm1, %v2160_v8 }
 0x1ed   : > { %1717 = vmatpush3.bf16.msra.mxu0 %v1716_v25  ;;  %1654 = vmatprep.mubr.msk.f32.mxu0 %vm1886_vm0, %v1887_v6 }
 0x1ee   : > { %1718 = vmatprep.subr.bf16.mxu0 %v1885_v3  ;;  %v1504_v3 = vld [vmem:[%s2343_s11] ss:$0 sm:$0xff] }
 0x1f1   : > { %1720 = vmatpush3.bf16.msra.mxu0 %v1719_v28  ;;  %v1512_v28 = vld [vmem:[%s2346_s14] ss:$0 sm:$0xff] }
 0x1f4   : > { %1655 = vmatmul.mubr.msk.f32.vlgmr.msra.gmra.mrb[8].mxu0 %vm583_vm1, %v756_v18 }
 0x2b7   : > { %v947_v35 = vpop.f32.mrb[4].mxu0 }
 0x2b8   : > { %v1120_v36 = vrot.slane %v947_v35, %v1108_v34  ;;  %v1634_v37 = vpop.f32.mrb[5].mxu0 }
 0x2ba   : > { %v1121_v52 = vsub.f32 %v1120_v36, %v871_v51 }
 0x2bf   : > { %v1028_v38 = vpop.f32.mrb[6].mxu0 }
 0x2c0   : > { %v1645_v39 = vpop.f32.mrb[7].mxu0  ;;  %v1029_v41 = vadd.f32 %v1504_v3, %v1028_v38 }
 0x2c7   : > { %v1102_v40 = vpop.f32.mrb[8].mxu0 }
 0x2c8   : > { %v1109_v42 = vrot.slane %v1102_v40, %v1108_v34  ;;  %v1656_v43 = vpop.f32.mrb[9].mxu0 }
 0x2ca   : > { %v1110_v44 = vadd.f32 %v1109_v42, %v1029_v41 }
 0x2cc   : > { %v1507_v45 = vmul.f32 -1.442695, %v1110_v44 }
 0x2ce   : > { %1777 = vpow2.f32 %v1507_v45 }
 0x2d8   : > { %v1778_v46 = vpop.eup %1777 }
 0x2d9   : > { %v1114_v47 = vadd.f32 1.0, %v1778_v46 }
 0x2db   : > { %1779 = vrcp.f32 %v1114_v47 }
 0x2e5   : > { %v1780_v48 = vpop.eup %1779 }
 0x2e6   : > { %1130 = vperm.xlu1 %1772, %v1780_v48  }
 0x2ea   : > { %1773 = vset.pattern.permute.xlu1 %v1889_v49 }
 0x2eb   : > { %1124 = vperm.xlu1 %1773, %v1780_v48  }
 0x365   : > { %v1131_v53 = vpop.permute.xlu1 %1130 }
 0x366   : > { %v1133_v54 = vmul.f32 %v1131_v53, %v1121_v52 }
 0x368   : > { %v1134_v55 = vadd.f32 %v1133_v54, %v871_v51 }
 0x36a   : > { %1137 = vrot.lane.b32.xlu0 %v1134_v55, %s1890_s26  ;;  %v1125_v56 = vpop.permute.xlu1 %1124 }
 0x36b   : > { %v1127_v57 = vmul.f32 %v1125_v56, %v1121_v52 }
 0x36d   : > { %v1128_v58 = vadd.f32 %v1127_v57, %v871_v51 }
 0x36f   : > { %v1135_v60 = vmul.f32 0.17677669, %v1128_v58 }
 0x3dc   : > { %v1138_v59 = vpop.permute.xlu0 %1137 }
 0x3dd   : > { %1658 = vmatpush3.xpose.msk.msra.mxu1 %vm583_vm1, %v1138_v59 }
 0x3de   : > { %1662 = vmatprep.subr.mxu1 %v1887_v6 }
 0x3e0   : > { %1660 = vmatmul.mubr.msk.f32.vlgmr.msra.gmra.mrb[2].mxu1 %vm583_vm1, %v1135_v60 }
 0x3e1   : > { %1664 = vmatprep.mubr.msk.f32.mxu1 %vm1886_vm0, %v1887_v6 }
 0x4b3   : > { %v1210_v61 = vpop.f32.mrb[2].mxu1 }
 0x4b4   : > { %v1661_v62 = vpop.f32.mrb[3].mxu1  ;;  %v1215_v63 = vsel %vm1214_vm2, %v1210_v61, -inf  ;;  %1367 = vst.msk [vmem:[%s2230_s1] sm:$0xff] %vm1214_vm2, %v1210_v61 }
 0x4b5   : > { %1216 = vmax.xlane.f32.xlu1 %v1215_v63 }
 0x4c6   : > { %1227 = vrot.lane.b32.xlu1 %v871_v51, %s1891_s21 }
 0x542   : > { %v1217_v6 = vpop.xlane.xlu1 %1216 }
 0x543   : > { %v1218_v0 = vsub.f32 %v1210_v61, %v1217_v6 }
 0x545   : > { %v1219_v1 = vmul.f32 1.442695, %v1218_v0 }
 0x546   : > { %v1228_v2 = vpop.permute.xlu1 %1227 }
 0x547   : > { %1781 = vpow2.f32 %v1219_v1  ;;  %1663 = vmatpush3.msra.mxu1 %v1228_v2 }
 0x551   : > { %v1782_v4 = vpop.eup %1781 }
 0x552   : > { %v1221_v5 = vsel %vm1214_vm2, %v1782_v4, 0.0 }
 0x553   : > { %1222 = vadd.xlane.f32.xlu0 %v1221_v5 }
 0x5e0   : > { %v1223_v7 = vpop.xlane.xlu0 %1222 }
 0x5e1   : > { %1783 = vrcp.f32 %v1223_v7 }
 0x5eb   : > { %v1784_v9 = vpop.eup %1783 }
 0x5ec   : > { %v1225_v10 = vmul.f32 %v1784_v9, %v1782_v4 }
 0x5ee   : > { %1665 = vmatmul.mubr.msk.f32.vlgmr.msra.gmra.mrb[4].mxu1 %vm1214_vm2, %v1225_v10 }
 0x6c1   : > { %v1299_v11 = vpop.f32.mrb[4].mxu1 }
 0x6c2   : > { %v1300_v12 = vadd.f32 %v1299_v11, %v2160_v8  ;;  %v1666_v13 = vpop.f32.mrb[5].mxu1 }
 0x6c4   : > { %v1305_v14 = vsel %vm583_vm1, %v1300_v12, 0.0  ;;  %v1309_v15 = vmul.f32 %v1300_v12, %v1300_v12 }
 0x6c5   : > { %1306 = vadd.xlane.f32.xlu0 %v1305_v14 }
 0x6c6   : > { %v1310_v17 = vsel %vm583_vm1, %v1309_v15, 0.0 }
 0x6c7   : > { %1311 = vadd.xlane.f32.xlu1 %v1310_v17 }
 0x752   : > { %v1307_v18 = vpop.xlane.xlu0 %1306 }
 0x753   : > { %v1308_v19 = vmul.f32 0.03125, %v1307_v18 }
 0x754   : > { %v1312_v20 = vpop.xlane.xlu1 %1311 }
 0x755   : > { %v1314_v21 = vmul.f32 %v1308_v19, %v1308_v19  ;;  %v1313_v22 = vmul.f32 0.03125, %v1312_v20  ;;  %v1316_v8 = vsub.f32 %v1300_v12, %v1308_v19 }
 0x757   : > { %v1315_v23 = vsub.f32 %v1313_v22, %v1314_v21 }
 0x759   : > { %v1317_v24 = vadd.f32 1e-05, %v1315_v23 }
 0x75b   : > { %1785 = vrsqrt.f32 %v1317_v24 }
 0x765   : > { %v1786_v25 = vpop.eup %1785 }
 0x766   : > { %v1319_v27 = vmul.f32 %v1786_v25, %v1316_v8 }
 0x768   : > { %v1326_v29 = vmul.f32 %v1511_v26, %v1319_v27 }
 0x76a   : > { %v1333_v30 = vadd.f32 %v1512_v28, %v1326_v29 }
 0x76c   : > { %v1334_v31 = vadd.f32 %v1333_v30, %v2080_v16 }
 0x76e   : > { %v1337_v32 = vsel %vm583_vm1, %v1334_v31, 0.0  ;;  %v1341_v33 = vmul.f32 %v1334_v31, %v1334_v31 }
 0x76f   : > { %1338 = vadd.xlane.f32.xlu0 %v1337_v32 }
 0x770   : > { %v1342_v34 = vsel %vm583_vm1, %v1341_v33, 0.0 }
 0x773   : > { %1343 = vadd.xlane.f32.xlu0 %v1342_v34 }
 0x774   : > { %1802 = shalt.err (!%p1799_p3)
}
 0x775   : > { %s1803_s1 = scalar_lea.hbm %s2254_s24, 128  ;;  %s1807_s29 = scalar_lea.hbm %s2350_s18, 256 }
 0x776   : > { %p1804_p4 = scmp.ne.s32.totalorder %s2254_s24, %s1803_s1  ;;  %p1808_p9 = scmp.lt.u32.totalorder %s2254_s24, %s2350_s18 }
 0x777   : > { %p1809_p10 = scmp.lt.u32.totalorder %s1807_s29, %s1803_s1  ;;  %p1811_p12 = scmp.lt.u32.totalorder %s1803_s1, %s2254_s24 }
 0x778   : > { %p1805_p7 = pnand %p1804_p4, %p2027_p5 }
 0x779   : > { %p1810_p11 = por %p1809_p10, %p1808_p9 }
 0x77a   : > { %p1806_p8 = pneg %p1805_p7 }
 0x77b   : > { %p1812_p13 = por %p1811_p12, %p1810_p11 }
 0x77d   : > { %p1813_p0 = pnand %p1812_p13, %p1806_p8 }
 0x77f   : > { %1816 = shalt.err (!%p1813_p0)
}
 0x780   : > { %1722 = dma.vmem_to_hbm [thread:$0]  (%p2027_p5), %s1401_s22, 128, %s2254_s24, %s1374_s19   ;;  %v1513_v42 = vld [vmem:[%s2347_s15] ss:$0 sm:$0xff] }
 0x781   : > { %v1514_v44 = vld [vmem:[%s2348_s16] ss:$0 sm:$0xff]  ;;  %s2375_s22 = sshll.u32 %s2224_s25, 3  ;;  %s2376_s26 = sshll.u32 %s2010_s0, 7 }
 0x782   : > { %s570_s19 = scalar_lea.vmem [#allocation2], %s2375_s22  ;;  %s2288_s3 = scalar_lea.hbm %s2349_s17, %s2376_s26 }
 0x783   : > { %s1387_s1 = sshll.u32 %s570_s19, 4  ;;  %s1369_s4 = scalar_lea.sflag [#allocation3], %s2224_s25  ;;  %s2290_s1 = int_to_ptr.vmem [resolvable:$true] %s1387_s1 }
 0x784   : > { %s1817_s23 = scalar_lea.vmem %s2290_s1, 128  ;;  %s1893_s20 = smov [#allocation2]  }
 0x785   : > { %p1818_p1 = scmp.ne.s32.totalorder %s2290_s1, %s1817_s23  ;;  %s1821_s0 = sshll.u32 %s1893_s20, 4  ;;  %s1822_s0 = int_to_ptr.vmem [resolvable:$false] %s1821_s0 }
 0x786   : > { %s1823_s24 = scalar_lea.vmem %s1822_s0, 256  ;;  %p1824_p4 = scmp.lt.s32.totalorder %s2290_s1, %s1822_s0 }
 0x787   : > { %p1819_p2 = pnand %p1818_p1, %p2027_p5  ;;  %p1825_p7 = scmp.lt.s32.totalorder %s1823_s24, %s1817_s23 }
 0x789   : > { %p1820_p3 = pneg %p1819_p2  ;;  %p1826_p8 = por %p1825_p7, %p1824_p4 }
 0x78b   : > { %p1827_p9 = pnand %p1826_p8, %p1820_p3 }
 0x7fc   : > { %v1339_v16 = vpop.xlane.xlu0 %1338 }
 0x7fd   : > { %v1340_v35 = vmul.f32 0.03125, %v1339_v16 }
 0x7ff   : > { %v1346_v37 = vmul.f32 %v1340_v35, %v1340_v35  ;;  %v1348_v40 = vsub.f32 %v1334_v31, %v1340_v35 }
 0x800   : > { %v1344_v36 = vpop.xlane.xlu0 %1343 }
 0x801   : > { %v1345_v38 = vmul.f32 0.03125, %v1344_v36 }
 0x803   : > { %v1347_v39 = vsub.f32 %v1345_v38, %v1346_v37 }
 0x805   : > { %v1349_v3 = vadd.f32 1e-05, %v1347_v39 }
 0x807   : > { %1787 = vrsqrt.f32 %v1349_v3 }
 0x811   : > { %v1788_v41 = vpop.eup %1787 }
 0x812   : > { %v1351_v43 = vmul.f32 %v1788_v41, %v1348_v40 }
 0x814   : > { %v1358_v45 = vmul.f32 %v1513_v42, %v1351_v43 }
 0x816   : > { %v1365_v46 = vadd.f32 %v1514_v44, %v1358_v45 }
 0x818   : > { %1366 = vst.msk [vmem:[%s570_s19] sm:$0xff] %vm583_vm1, %v1365_v46 }
 0x819   : > { %1830 = shalt.err (!%p1827_p9)
}
 0x81a   : > { %s1831_s25 = scalar_lea.hbm %s2288_s3, 128  ;;  %s1835_s26 = scalar_lea.hbm %s2349_s17, 256 }
 0x81b   : > { %p1832_p10 = scmp.ne.s32.totalorder %s2288_s3, %s1831_s25  ;;  %p1836_p13 = scmp.lt.u32.totalorder %s2288_s3, %s2349_s17 }
 0x81c   : > { %p1837_p0 = scmp.lt.u32.totalorder %s1835_s26, %s1831_s25  ;;  %p1839_p2 = scmp.lt.u32.totalorder %s1831_s25, %s2288_s3 }
 0x81d   : > { %p1833_p11 = pnand %p1832_p10, %p2027_p5 }
 0x81e   : > { %p1838_p1 = por %p1837_p0, %p1836_p13 }
 0x81f   : > { %p1834_p12 = pneg %p1833_p11 }
 0x820   : > { %p1840_p3 = por %p1839_p2, %p1838_p1 }
 0x822   : > { %p1841_p4 = pnand %p1840_p3, %p1834_p12 }
 0x824   : > { %1844 = shalt.err (!%p1841_p4)
}
 0x825   : > { %1721 = dma.vmem_to_hbm [thread:$0]  (%p2027_p5), %s2290_s1, 128, %s2288_s3, %s1369_s4  }
 0x826 PF: > { %p1732_p7 = scmp.ge.s32.totalorder %s1883_s30, 2  ;;  %s1412_s20 = sand.u32 1, %s1871_s27  }
 0x827   : > { %s1413_s0 = scalar_lea.sflag [#allocation3], %s1412_s20 }
 0x828   : > { %p1726_p8 = pnand %p1732_p7, %p2031_p6 }
 0x82a   : > { %1862 = dma.done.wait (!%p1726_p8), %s1413_s0, 128  }
 0x82b   : > { %1864 = vsyncadd (!%p1726_p8), %s1413_s0, 4294967168  ;;  %s1422_s24 = scalar_lea.sflag [#allocation5], %s1412_s20 }
 0x82c   : > { %1866 = dma.done.wait (!%p1726_p8), %s1422_s24, 128  }
 0x82d   : > { %1868 = vsyncadd (!%p1726_p8), %s1422_s24, 4294967168  ;;  %s2378_s30 = sld [smem:[#allocation9_spill]]  ;;  %s2379_s2 = sld [smem:[#allocation8_spill]] }
 0x82e   : > { %s2380_s29 = sld [smem:[#allocation10_spill]]  ;;  %s2381_s27 = smov %s1875_s28 }
 0x833   : > { %p32_p5 = scmp.ge.s32.totalorder %s2378_s30, 4   ;;  %s2382_s28 = smov %s2379_s2 }
 0x835   :  { %34 = sbr.rel (!%p32_p5) target bundleno = 11 (0xb), region = 140 }
 0x83c   :  { %1427 = vsyncpa [#allocation3], 1 }
 0x83d   :  { %1429 = vsyncpa [#allocation3 + $0x1], 1 }
 0x83e   :  { %1430 = vsyncpa [#allocation5], 1 }
 0x83f   :  { %1432 = vsyncpa [#allocation5 + $0x1], 1 }

// kernel: tpu_custom_call.1
= control target key start
LH: loop header
LB: loop body
LE: loop exit
PB: predicated region body
PF: predicated region fallthrough
CT: control target
= control target key end

     0   :  { %s2332_s0 = inlined_call_operand.vmem [shape: f32[2,8,32], index: 0, kind: input, shape index: {}]   ;;  %s2333_s1 = inlined_call_operand.vmem [shape: f32[32,128], index: 1, kind: input, shape index: {}]   ;;  %s2334_s2 = inlined_call_operand.vmem [shape: f32[1,128], index: 2, kind: input, shape index: {}]   ;;  %s2335_s3 = inlined_call_operand.vmem [shape: f32[128,32], index: 3, kind: input, shape index: {}]   ;;  %s2336_s4 = inlined_call_operand.vmem [shape: f32[1,32], index: 4, kind: input, shape index: {}]   ;;  %s2337_s5 = inlined_call_operand.vmem [shape: f32[1,32], index: 5, kind: input, shape index: {}]   ;;  %s2338_s6 = inlined_call_operand.vmem [shape: f32[1,32], index: 6, kind: input, shape index: {}]   ;;  %s2339_s7 = inlined_call_operand.vmem [shape: f32[32,96], index: 7, kind: input, shape index: {}]   ;;  %s2340_s8 = inlined_call_operand.vmem [shape: f32[1,96], index: 8, kind: input, shape index: {}]   ;;  %s2341_s9 = inlined_call_operand.vmem [shape: f32[32,64], index: 9, kind: input, shape index: {}]   ;;  %s2342_s10 = inlined_call_operand.vmem [shape: f32[32,2], index: 10, kind: input, shape index: {}]   ;;  %s2343_s11 = inlined_call_operand.vmem [shape: f32[1,2], index: 11, kind: input, shape index: {}]   ;;  %s2344_s12 = inlined_call_operand.vmem [shape: f32[32,2], index: 12, kind: input, shape index: {}]   ;;  %s2345_s13 = inlined_call_operand.vmem [shape: f32[1,32], index: 13, kind: input, shape index: {}]   ;;  %s2346_s14 = inlined_call_operand.vmem [shape: f32[1,32], index: 14, kind: input, shape index: {}]   ;;  %s2347_s15 = inlined_call_operand.vmem [shape: f32[1,32], index: 15, kind: input, shape index: {}]   ;;  %s2348_s16 = inlined_call_operand.vmem [shape: f32[1,32], index: 16, kind: input, shape index: {}]   ;;  %s2349_s17 = inlined_call_operand.hbm [shape: f32[2,8,32], index: 17, kind: output, shape index: {0}]   ;;  %s2350_s18 = inlined_call_operand.hbm [shape: f32[2,8,8], index: 18, kind: output, shape index: {1}]  }
   0x1   :  { %2359 = sst [smem:[#allocation12_spill]] %s2332_s0 }
   0x2   :  { %2360 = sst [smem:[#allocation13_spill]] %s2333_s1 }
   0x3   :  { %2361 = sst [smem:[#allocation14_spill]] %s2334_s2 }
   0x4   :  { %2362 = sst [smem:[#allocation15_spill]] %s2335_s3 }
   0x5   :  { %2363 = sst [smem:[#allocation16_spill]] %s2336_s4 }
   0x6   :  { %24 = vsyncpa [#allocation3], 0 }
   0x7   :  { %26 = vsyncpa [#allocation3 + $0x1], 0 }
   0x8   :  { %27 = vsyncpa [#allocation5], 0 }
   0x9   :  { %29 = vsyncpa [#allocation5 + $0x1], 0  ;;  %s1989_s27 = smov 0   ;;  %s1991_s28 = smov 0  }
   0xa   :  { %s1993_s29 = smov 0   ;;  %s1995_s30 = smov 0  }
   0xb LB: > { %2364 = sst [smem:[#allocation8_spill]] %s1879_s29  ;;  %s2010_s0 = sadd.s32 4294967295, %s1883_s30   ;;  %s1883_s30 = sphi %s1995_s30, %s2378_s30   ;;  %s1879_s29 = sphi %s1993_s29, %s2380_s29   ;;  %s1875_s28 = sphi %s1991_s28, %s2382_s28   ;;  %s1871_s27 = sphi %s1989_s27, %s2381_s27  }
   0xc   : > { %s1491_s19 = sadd.s32 4294967294, %s1883_s30   ;;  %s2014_s1 = sadd.s32 1, %s1883_s30  }
   0xd   : > { %2365 = sst [smem:[#allocation9_spill]] %s2014_s1  ;;  %s404_s20 = sadd.s32 1, %s1879_s29 }
   0xe   : > { %s401_s21 = ssub.s32 %s1883_s30, %s2014_s1  ;;  %p414_p0 = scmp.ne.s32.totalorder %s1879_s29, %s1875_s28 }
   0xf   : > { %p402_p1 = scmp.eq.s32.totalorder %s401_s21, 0  ;;  %p415_p2 = scmp.eq.s32.totalorder %s2010_s0, 1 }
  0x10   : > { %p420_p3 = scmp.ne.s32.totalorder %s1875_s28, %s1871_s27  ;;  %p421_p4 = scmp.eq.s32.totalorder %s1491_s19, 1 }
  0x11   : > { %s2025_s22 = scalar_select %p402_p1, %s1879_s29, %s404_s20  }
  0x12   : > { %p2027_p5 = por %p415_p2, %p414_p0  ;;  %p2031_p6 = por %p421_p4, %p420_p3 }
  0x13   : > { %2366 = sst [smem:[#allocation10_spill]] %s2025_s22  ;;  %p1494_p7 = scmp.ge.s32.totalorder %s1883_s30, 1 }
  0x14   : > { %s2368_s23 = scalar_select %p2031_p6, 1, 0 }
  0x15   : > { %p520_p8 = scmp.lt.s32.totalorder %s1883_s30, 3 }
  0x16   : > { %2369 = sst [smem:[#allocation11_spill]] %s2368_s23 }
  0x17   : > { %p521_p9 = pnand %p1494_p7, %p520_p8 }
  0x18   : > { %s2370_s26 = sld [smem:[#allocation13_spill]] (!%p521_p9)  ;;  %v1885_v3 = vmov (!%p521_p9), 0.0|0.0   ;;  %vm1886_vm0 = vmmov (!%p521_p9), 0   ;;  %v1887_v6 = vmov (!%p521_p9), 0.0   ;;  %p578_p10 = scmp.lt.s32.totalorder (!%p521_p9), %s2010_s0, 1  ;;  %vm583_vm1 = vcmask (!%p521_p9), 261120  }
  0x19   : > { %524 = sbr.rel (%p521_p9) target bundleno = 2086 (0x826), region = 88  ;;  %1667 = vmatprep.subr.bf16.mxu0 (!%p521_p9), %v1885_v3  ;;  %1575 = vmatprep.mubr.msk.f32.mxu0 (!%p521_p9), %vm1886_vm0, %v1887_v6  ;;  %s2371_s3 = sld [smem:[#allocation15_spill]] (!%p521_p9)  ;;  %v790_v43 = vld [vmem:[%s2339_s7] sm:$0xff] (!%p521_p9)  ;;  %v791_v44 = vld [vmem:[%s2339_s7 + $0x8] sm:$0xff] (!%p521_p9)  ;;  %v792_v45 = vld [vmem:[%s2339_s7 + $0x10] sm:$0xff] (!%p521_p9)  ;;  %vm1214_vm2 = vcmask (!%p521_p9), 64512  }
  0x1a   : > { %1673 = vmatprep.subr.bf16.mxu1 (!%p521_p9), %v1885_v3  ;;  %1610 = vmatprep.mubr.msk.f32.mxu1 (!%p521_p9), %vm1886_vm0, %v1887_v6  ;;  %v1698_v46 = vpack.c.bf16 (!%p521_p9), %v791_v44, %v790_v43  ;;  %v793_v47 = vld [vmem:[%s2339_s7 + $0x18] sm:$0xff] (!%p521_p9)  ;;  %v1499_v63 = vld [vmem:[%s2337_s5] ss:$0 sm:$0xff] (!%p521_p9)  ;;  %s2374_s4 = sld [smem:[#allocation16_spill]] (!%p521_p9)  ;;  %s1891_s21 = smov (!%p521_p9), 64  }
  0x1b   : > { %v1701_v48 = vpack.c.bf16 (!%p521_p9), %v793_v47, %v792_v45 }
  0x1e   : > { %v593_v0 = vld [vmem:[%s2370_s26] sm:$0xff] (!%p521_p9)  ;;  %v594_v1 = vld [vmem:[%s2370_s26 + $0x8] sm:$0xff] (!%p521_p9)  ;;  %v595_v2 = vld [vmem:[%s2370_s26 + $0x10] sm:$0xff] (!%p521_p9) }
  0x1f   : > { %v1668_v4 = vpack.c.bf16 (!%p521_p9), %v594_v1, %v593_v0  ;;  %v596_v5 = vld [vmem:[%s2370_s26 + $0x18] sm:$0xff] (!%p521_p9)  ;;  %v672_v7 = vld [vmem:[%s2371_s3] sm:$0xff] (!%p521_p9)  ;;  %v673_v8 = vld [vmem:[%s2371_s3 + $0x8] sm:$0xff] (!%p521_p9)  ;;  %s2372_s26 = sld [smem:[#allocation12_spill]] (!%p521_p9) }
  0x20   : > { %v1674_v9 = vpack.c.bf16 %v673_v8, %v672_v7  ;;  %v674_v10 = vld [vmem:[%s2371_s3 + $0x10] sm:$0xff]  ;;  %v675_v11 = vld [vmem:[%s2371_s3 + $0x18] sm:$0xff]  ;;  %v1671_v12 = vpack.c.bf16 %v596_v5, %v595_v2  ;;  %s579_s24 = scalar_select %p578_p10, %s2010_s0, 1  ;;  %v676_v14 = vld [vmem:[%s2371_s3 + $0x20] sm:$0xff] }
  0x21   : > { %1669 = vmatpush3.bf16.msra.mxu0 %v1668_v4  ;;  %v1677_v13 = vpack.c.bf16 %v675_v11, %v674_v10  ;;  %v677_v15 = vld [vmem:[%s2371_s3 + $0x28] sm:$0xff]  ;;  %v678_v20 = vld [vmem:[%s2371_s3 + $0x30] sm:$0xff]  ;;  %v679_v21 = vld [vmem:[%s2371_s3 + $0x38] sm:$0xff] }
  0x22   : > { %1670 = vmatprep.subr.bf16.mxu0 %v1885_v3  ;;  %1675 = vmatpush3.bf16.msra.mxu1 %v1674_v9  ;;  %s1497_s25 = sshll.u32 %s579_s24, 3  ;;  %v1680_v18 = vpack.c.bf16 %v677_v15, %v676_v14  ;;  %v1683_v23 = vpack.c.bf16 %v679_v21, %v678_v20  ;;  %v680_v25 = vld [vmem:[%s2371_s3 + $0x40] sm:$0xff]  ;;  %v681_v26 = vld [vmem:[%s2371_s3 + $0x48] sm:$0xff]  ;;  %v682_v30 = vld [vmem:[%s2371_s3 + $0x50] sm:$0xff]  ;;  %s2373_s24 = sld [smem:[#allocation14_spill]] }
  0x23   : > { %1676 = vmatprep.subr.bf16.mxu1 %v1885_v3  ;;  %v1686_v28 = vpack.c.bf16 %v681_v26, %v680_v25  ;;  %v683_v31 = vld [vmem:[%s2371_s3 + $0x58] sm:$0xff]  ;;  %v684_v35 = vld [vmem:[%s2371_s3 + $0x60] sm:$0xff]  ;;  %v685_v36 = vld [vmem:[%s2371_s3 + $0x68] sm:$0xff] }
  0x24   : > { %v1689_v33 = vpack.c.bf16 %v683_v31, %v682_v30  ;;  %v1692_v37 = vpack.c.bf16 %v685_v36, %v684_v35  ;;  %v686_v38 = vld [vmem:[%s2371_s3 + $0x70] sm:$0xff]  ;;  %v687_v39 = vld [vmem:[%s2371_s3 + $0x78] sm:$0xff]  ;;  %v874_v1 = vld [vmem:[%s2341_s9] sm:$0xff]  ;;  %v1888_v31 = vmov 1  }
  0x25   : > { %s581_s23 = scalar_lea.vmem %s2372_s26, %s1497_s25  ;;  %1672 = vmatpush3.bf16.msra.mxu0 %v1671_v12  ;;  %v1695_v40 = vpack.c.bf16 %v687_v39, %v686_v38  ;;  %v875_v2 = vld [vmem:[%s2341_s9 + $0x8] sm:$0xff]  ;;  %v1500_v4 = vld [vmem:[%s2338_s6] ss:$0 sm:$0xff]  ;;  %v876_v9 = vld [vmem:[%s2341_s9 + $0x10] sm:$0xff]  ;;  %1772 = vset.pattern.permute.xlu1 %v1888_v31  ;;  %s1890_s26 = smov 96  }
  0x26   : > { %v2080_v16 = vld [vmem:[%s581_s23] sm:$0xff]  ;;  %1678 = vmatpush3.bf16.msra.mxu1 %v1677_v13  ;;  %1697 = vmatprep.subr.bf16.mxu0 %v1885_v3  ;;  %v1704_v7 = vpack.c.bf16 %v875_v2, %v874_v1  ;;  %v877_v10 = vld [vmem:[%s2341_s9 + $0x18] sm:$0xff]  ;;  %v952_v13 = vld [vmem:[%s2342_s10 + $0x8] sm:$0xff]  ;;  %s2224_s25 = sand.u32 1, %s1875_s28   ;;  %s2358_s23 = sshll.u32 %s2010_s0, 7 }
  0x27   : > { %v584_v17 = vsel %vm583_vm1, %v2080_v16, 0.0  ;;  %1679 = vmatprep.subr.bf16.mxu1 %v1885_v3  ;;  %v765_v41 = vmul.f32 %v2080_v16, %v2080_v16  ;;  %v1707_v11 = vpack.c.bf16 %v877_v10, %v876_v9  ;;  %v951_v12 = vld [vmem:[%s2342_s10] sm:$0xff]  ;;  %v953_v20 = vld [vmem:[%s2342_s10 + $0x10] sm:$0xff]  ;;  %v954_v21 = vld [vmem:[%s2342_s10 + $0x18] sm:$0xff]  ;;  %1774 = vset.pattern.permute.xlu0 %v1888_v31  ;;  %s2357_s29 = sshll.u32 %s2224_s25, 3  ;;  %s1374_s19 = scalar_lea.sflag [#allocation5], %s2224_s25 }
  0x28   : > { %v585_v19 = vrot.slane %v584_v17, 4  ;;  %761 = vadd.xlane.f32.xlu0 %v584_v17  ;;  %v597_v49 = vld [vmem:[%s2373_s24] sm:$0x1]  ;;  %v1034_v26 = vld [vmem:[%s2344_s12 + $0x10] sm:$0xff]  ;;  %s2230_s1 = scalar_lea.vmem [#allocation4], %s2357_s29  ;;  %s2254_s24 = scalar_lea.hbm %s2350_s18, %s2358_s23 }
  0x29   : > { %v766_v42 = vsel %vm583_vm1, %v765_v41, 0.0  ;;  %v688_v14 = vld [vmem:[%s2374_s4] sm:$0x1]  ;;  %s1400_s22 = sshll.u32 %s2230_s1, 4  ;;  %s1892_s29 = smov [#allocation4]   ;;  %s1401_s22 = int_to_ptr.vmem [resolvable:$true] %s1400_s22 }
  0x2a   : > { %v586_v22 = vadd.f32 %v585_v19, %v584_v17  ;;  %1681 = vmatpush3.bf16.msra.mxu1 %v1680_v18  ;;  %v1710_v17 = vpack.c.bf16 %v952_v13, %v951_v12  ;;  %s1789_s20 = scalar_lea.vmem %s1401_s22, 128  ;;  %s1793_s3 = sshll.u32 %s1892_s29, 4  ;;  %s1794_s3 = int_to_ptr.vmem [resolvable:$false] %s1793_s3 }
  0x2b   : > { %1682 = vmatprep.subr.bf16.mxu1 %v1885_v3  ;;  %p1790_p11 = scmp.ne.s32.totalorder %s1401_s22, %s1789_s20  ;;  %s1795_s4 = scalar_lea.vmem %s1794_s3, 256 }
  0x2c   : > { %v587_v24 = vrot.slane %v586_v22, 2  ;;  %767 = vadd.xlane.f32.xlu0 %v766_v42  ;;  %p1796_p0 = scmp.lt.s32.totalorder %s1401_s22, %s1794_s3  ;;  %p1797_p1 = scmp.lt.s32.totalorder %s1795_s4, %s1789_s20 }
  0x2d   : > { %p1791_p12 = pnand %p1790_p11, %p2027_p5 }
  0x2e   : > { %v588_v27 = vadd.f32 %v587_v24, %v586_v22  ;;  %1684 = vmatpush3.bf16.msra.mxu1 %v1683_v23  ;;  %v1713_v22 = vpack.c.bf16 %v954_v21, %v953_v20  ;;  %v1032_v23 = vld [vmem:[%s2344_s12] sm:$0xff]  ;;  %v1033_v24 = vld [vmem:[%s2344_s12 + $0x8] sm:$0xff]  ;;  %p1798_p2 = por %p1797_p1, %p1796_p0 }
  0x2f   : > { %1685 = vmatprep.subr.bf16.mxu1 %v1885_v3  ;;  %v1716_v25 = vpack.c.bf16 %v1033_v24, %v1032_v23  ;;  %p1792_p13 = pneg %p1791_p12 }
  0x30   : > { %v589_v29 = vrot.slane %v588_v27, 1 }
  0x31   : > { %p1799_p3 = pnand %p1798_p2, %p1792_p13 }
  0x32   : > { %v590_v32 = vadd.f32 %v589_v29, %v588_v27  ;;  %1687 = vmatpush3.bf16.msra.mxu1 %v1686_v28  ;;  %v1035_v27 = vld [vmem:[%s2344_s12 + $0x18] sm:$0xff] }
  0x33   : > { %1688 = vmatprep.subr.bf16.mxu1 %v1885_v3  ;;  %v1719_v28 = vpack.c.bf16 %v1035_v27, %v1034_v26  ;;  %v1511_v26 = vld [vmem:[%s2345_s13] ss:$0 sm:$0xff] }
  0x34   : > { %v592_v34 = vmul.f32 0.125, %v590_v32  ;;  %v1106_v32 = vlaneseq }
  0x36   : > { %1576 = vmatmul.mubr.msk.f32.vlgmr.msra.gmra.mrb[0].mxu0 %vm583_vm1, %v592_v34  ;;  %1690 = vmatpush3.bf16.msra.mxu1 %v1689_v33  ;;  %v1107_v33 = vshrl.u32 %v1106_v32, 7 }
  0x37   : > { %1621 = vmatprep.mubr.msk.f32.mxu0 %vm1886_vm0, %v1887_v6  ;;  %1691 = vmatprep.subr.bf16.mxu1 %v1885_v3 }
  0x38   : > { %1699 = vmatpush3.bf16.msra.mxu0 %v1698_v46  ;;  %v1108_v34 = vsub.s32 0, %v1107_v33 }
  0x39   : > { %1700 = vmatprep.subr.bf16.mxu0 %v1885_v3 }
  0x3a   : > { %1693 = vmatpush3.bf16.msra.mxu1 %v1692_v37 }
  0x3b   : > { %1694 = vmatprep.subr.bf16.mxu1 %v1885_v3 }
  0x3c   : > { %1702 = vmatpush3.bf16.msra.mxu0 %v1701_v48 }
  0x3d   : > { %1703 = vmatprep.subr.bf16.mxu0 %v1885_v3 }
  0x3e   : > { %1696 = vmatpush3.bf16.msra.mxu1 %v1695_v40 }
  0x3f   : > { %1657 = vmatprep.subr.mxu1 %v1887_v6 }
  0xb5   : > { %v762_v54 = vpop.xlane.xlu0 %761 }
  0xb6   : > { %v764_v55 = vmul.f32 0.03125, %v762_v54 }
  0xb8   : > { %v770_v56 = vmul.f32 %v764_v55, %v764_v55  ;;  %v772_v61 = vsub.f32 %v2080_v16, %v764_v55 }
  0xb9   : > { %v768_v57 = vpop.xlane.xlu0 %767 }
  0xba   : > { %v769_v58 = vmul.f32 0.03125, %v768_v57 }
  0xbc   : > { %v771_v59 = vsub.f32 %v769_v58, %v770_v56 }
  0xbe   : > { %v773_v60 = vadd.f32 1e-05, %v771_v59 }
  0xc0   : > { %1775 = vrsqrt.f32 %v773_v60 }
  0xca   : > { %v1776_v62 = vpop.eup %1775 }
  0xcb   : > { %v775_v0 = vmul.f32 %v1776_v62, %v772_v61 }
  0xcd   : > { %v782_v5 = vmul.f32 %v1499_v63, %v775_v0 }
  0xcf   : > { %v2160_v8 = vadd.f32 %v1500_v4, %v782_v5 }
  0xd1   : > { %1622 = vmatmul.mubr.msk.f32.vlgmr.msra.gmra.mrb[2].mxu0 %vm583_vm1, %v2160_v8 }
  0xd2   : > { %1705 = vmatpush3.bf16.msra.mxu0 %v1704_v7  ;;  %1632 = vmatprep.mubr.msk.f32.mxu0 %vm1886_vm0, %v1887_v6 }
  0xd3   : > { %1706 = vmatprep.subr.bf16.mxu0 %v1885_v3 }
  0xd6   : > { %1708 = vmatpush3.bf16.msra.mxu0 %v1707_v11 }
  0xd7   : > { %1709 = vmatprep.subr.bf16.mxu0 %v1885_v3 }
 0x109   : > { %v667_v50 = vpop.f32.mrb[0].mxu0 }
 0x10a   : > { %v668_v51 = vadd.f32 %v667_v50, %v597_v49  ;;  %v1577_v52 = vpop.f32.mrb[1].mxu0  ;;  %v1889_v49 = vmov 0   ;;  %v1501_v50 = vld [vmem:[%s2340_s8] ss:$0 sm:$0xff] }
 0x10c   : > { %v671_v53 = vmax.f32 %v668_v51, 0.0 }
 0x10e   : > { %1611 = vmatmul.mubr.f32.vlgmr.msra.gmra.mrb[0].mxu1 %v671_v53 }
 0x10f   : > { %1659 = vmatprep.mubr.msk.f32.mxu1 %vm1886_vm0, %v1887_v6 }
 0x1a4   : > { %v870_v29 = vpop.f32.mrb[2].mxu0 }
 0x1a5   : > { %v1623_v30 = vpop.f32.mrb[3].mxu0  ;;  %v871_v51 = vadd.f32 %v1501_v50, %v870_v29 }
 0x1e1   : > { %v755_v15 = vpop.f32.mrb[0].mxu1 }
 0x1e2   : > { %v756_v18 = vadd.f32 %v755_v15, %v688_v14  ;;  %v1612_v19 = vpop.f32.mrb[1].mxu1 }
 0x1e4   : > { %1633 = vmatmul.mubr.msk.f32.vlgmr.msra.gmra.mrb[4].mxu0 %vm583_vm1, %v756_v18 }
 0x1e5   : > { %1711 = vmatpush3.bf16.msra.mxu0 %v1710_v17  ;;  %1643 = vmatprep.mubr.msk.f32.mxu0 %vm1886_vm0, %v1887_v6 }
 0x1e6   : > { %1712 = vmatprep.subr.bf16.mxu0 %v1885_v3 }
 0x1e9   : > { %1714 = vmatpush3.bf16.msra.mxu0 %v1713_v22 }
 0x1ea   : > { %1715 = vmatprep.subr.bf16.mxu0 %v1885_v3 }
 0x1ec   : > { %1644 = vmatmul.mubr.msk.f32.vlgmr.msra.gmra.mrb[6].mxu0 %vm583_vm1, %v2160_v8 }
 0x1ed   : > { %1717 = vmatpush3.bf16.msra.mxu0 %v1716_v25  ;;  %1654 = vmatprep.mubr.msk.f32.mxu0 %vm1886_vm0, %v1887_v6 }
 0x1ee   : > { %1718 = vmatprep.subr.bf16.mxu0 %v1885_v3  ;;  %v1504_v3 = vld [vmem:[%s2343_s11] ss:$0 sm:$0xff] }
 0x1f1   : > { %1720 = vmatpush3.bf16.msra.mxu0 %v1719_v28  ;;  %v1512_v28 = vld [vmem:[%s2346_s14] ss:$0 sm:$0xff] }
 0x1f4   : > { %1655 = vmatmul.mubr.msk.f32.vlgmr.msra.gmra.mrb[8].mxu0 %vm583_vm1, %v756_v18 }
 0x2b7   : > { %v947_v35 = vpop.f32.mrb[4].mxu0 }
 0x2b8   : > { %v1120_v36 = vrot.slane %v947_v35, %v1108_v34  ;;  %v1634_v37 = vpop.f32.mrb[5].mxu0 }
 0x2ba   : > { %v1121_v52 = vsub.f32 %v1120_v36, %v871_v51 }
 0x2bf   : > { %v1028_v38 = vpop.f32.mrb[6].mxu0 }
 0x2c0   : > { %v1645_v39 = vpop.f32.mrb[7].mxu0  ;;  %v1029_v41 = vadd.f32 %v1504_v3, %v1028_v38 }
 0x2c7   : > { %v1102_v40 = vpop.f32.mrb[8].mxu0 }
 0x2c8   : > { %v1109_v42 = vrot.slane %v1102_v40, %v1108_v34  ;;  %v1656_v43 = vpop.f32.mrb[9].mxu0 }
 0x2ca   : > { %v1110_v44 = vadd.f32 %v1109_v42, %v1029_v41 }
 0x2cc   : > { %v1507_v45 = vmul.f32 -1.442695, %v1110_v44 }
 0x2ce   : > { %1777 = vpow2.f32 %v1507_v45 }
 0x2d8   : > { %v1778_v46 = vpop.eup %1777 }
 0x2d9   : > { %v1114_v47 = vadd.f32 1.0, %v1778_v46 }
 0x2db   : > { %1779 = vrcp.f32 %v1114_v47 }
 0x2e5   : > { %v1780_v48 = vpop.eup %1779 }
 0x2e6   : > { %1130 = vperm.xlu1 %1772, %v1780_v48  }
 0x2ea   : > { %1773 = vset.pattern.permute.xlu1 %v1889_v49 }
 0x2eb   : > { %1124 = vperm.xlu1 %1773, %v1780_v48  }
 0x365   : > { %v1131_v53 = vpop.permute.xlu1 %1130 }
 0x366   : > { %v1133_v54 = vmul.f32 %v1131_v53, %v1121_v52 }
 0x368   : > { %v1134_v55 = vadd.f32 %v1133_v54, %v871_v51 }
 0x36a   : > { %1137 = vrot.lane.b32.xlu0 %v1134_v55, %s1890_s26  ;;  %v1125_v56 = vpop.permute.xlu1 %1124 }
 0x36b   : > { %v1127_v57 = vmul.f32 %v1125_v56, %v1121_v52 }
 0x36d   : > { %v1128_v58 = vadd.f32 %v1127_v57, %v871_v51 }
 0x36f   : > { %v1135_v60 = vmul.f32 0.17677669, %v1128_v58 }
 0x3dc   : > { %v1138_v59 = vpop.permute.xlu0 %1137 }
 0x3dd   : > { %1658 = vmatpush3.xpose.msk.msra.mxu1 %vm583_vm1, %v1138_v59 }
 0x3de   : > { %1662 = vmatprep.subr.mxu1 %v1887_v6 }
 0x3e0   : > { %1660 = vmatmul.mubr.msk.f32.vlgmr.msra.gmra.mrb[2].mxu1 %vm583_vm1, %v1135_v60 }
 0x3e1   : > { %1664 = vmatprep.mubr.msk.f32.mxu1 %vm1886_vm0, %v1887_v6 }
 0x4b3   : > { %v1210_v61 = vpop.f32.mrb[2].mxu1 }
 0x4b4   : > { %v1661_v62 = vpop.f32.mrb[3].mxu1  ;;  %v1215_v63 = vsel %vm1214_vm2, %v1210_v61, -inf  ;;  %1367 = vst.msk [vmem:[%s2230_s1] sm:$0xff] %vm1214_vm2, %v1210_v61 }
 0x4b5   : > { %1216 = vmax.xlane.f32.xlu1 %v1215_v63 }
 0x4c6   : > { %1227 = vrot.lane.b32.xlu1 %v871_v51, %s1891_s21 }
 0x542   : > { %v1217_v6 = vpop.xlane.xlu1 %1216 }
 0x543   : > { %v1218_v0 = vsub.f32 %v1210_v61, %v1217_v6 }
 0x545   : > { %v1219_v1 = vmul.f32 1.442695, %v1218_v0 }
 0x546   : > { %v1228_v2 = vpop.permute.xlu1 %1227 }
 0x547   : > { %1781 = vpow2.f32 %v1219_v1  ;;  %1663 = vmatpush3.msra.mxu1 %v1228_v2 }
 0x551   : > { %v1782_v4 = vpop.eup %1781 }
 0x552   : > { %v1221_v5 = vsel %vm1214_vm2, %v1782_v4, 0.0 }
 0x553   : > { %1222 = vadd.xlane.f32.xlu0 %v1221_v5 }
 0x5e0   : > { %v1223_v7 = vpop.xlane.xlu0 %1222 }
 0x5e1   : > { %1783 = vrcp.f32 %v1223_v7 }
 0x5eb   : > { %v1784_v9 = vpop.eup %1783 }
 0x5ec   : > { %v1225_v10 = vmul.f32 %v1784_v9, %v1782_v4 }
 0x5ee   : > { %1665 = vmatmul.mubr.msk.f32.vlgmr.msra.gmra.mrb[4].mxu1 %vm1214_vm2, %v1225_v10 }
 0x6c1   : > { %v1299_v11 = vpop.f32.mrb[4].mxu1 }
 0x6c2   : > { %v1300_v12 = vadd.f32 %v1299_v11, %v2160_v8  ;;  %v1666_v13 = vpop.f32.mrb[5].mxu1 }
 0x6c4   : > { %v1305_v14 = vsel %vm583_vm1, %v1300_v12, 0.0  ;;  %v1309_v15 = vmul.f32 %v1300_v12, %v1300_v12 }
 0x6c5   : > { %1306 = vadd.xlane.f32.xlu0 %v1305_v14 }
 0x6c6   : > { %v1310_v17 = vsel %vm583_vm1, %v1309_v15, 0.0 }
 0x6c7   : > { %1311 = vadd.xlane.f32.xlu1 %v1310_v17 }
 0x752   : > { %v1307_v18 = vpop.xlane.xlu0 %1306 }
 0x753   : > { %v1308_v19 = vmul.f32 0.03125, %v1307_v18 }
 0x754   : > { %v1312_v20 = vpop.xlane.xlu1 %1311 }
 0x755   : > { %v1314_v21 = vmul.f32 %v1308_v19, %v1308_v19  ;;  %v1313_v22 = vmul.f32 0.03125, %v1312_v20  ;;  %v1316_v8 = vsub.f32 %v1300_v12, %v1308_v19 }
 0x757   : > { %v1315_v23 = vsub.f32 %v1313_v22, %v1314_v21 }
 0x759   : > { %v1317_v24 = vadd.f32 1e-05, %v1315_v23 }
 0x75b   : > { %1785 = vrsqrt.f32 %v1317_v24 }
 0x765   : > { %v1786_v25 = vpop.eup %1785 }
 0x766   : > { %v1319_v27 = vmul.f32 %v1786_v25, %v1316_v8 }
 0x768   : > { %v1326_v29 = vmul.f32 %v1511_v26, %v1319_v27 }
 0x76a   : > { %v1333_v30 = vadd.f32 %v1512_v28, %v1326_v29 }
 0x76c   : > { %v1334_v31 = vadd.f32 %v1333_v30, %v2080_v16 }
 0x76e   : > { %v1337_v32 = vsel %vm583_vm1, %v1334_v31, 0.0  ;;  %v1341_v33 = vmul.f32 %v1334_v31, %v1334_v31 }
 0x76f   : > { %1338 = vadd.xlane.f32.xlu0 %v1337_v32 }
 0x770   : > { %v1342_v34 = vsel %vm583_vm1, %v1341_v33, 0.0 }
 0x773   : > { %1343 = vadd.xlane.f32.xlu0 %v1342_v34 }
 0x774   : > { %1802 = shalt.err (!%p1799_p3)
}
 0x775   : > { %s1803_s1 = scalar_lea.hbm %s2254_s24, 128  ;;  %s1807_s29 = scalar_lea.hbm %s2350_s18, 256 }
 0x776   : > { %p1804_p4 = scmp.ne.s32.totalorder %s2254_s24, %s1803_s1  ;;  %p1808_p9 = scmp.lt.u32.totalorder %s2254_s24, %s2350_s18 }
 0x777   : > { %p1809_p10 = scmp.lt.u32.totalorder %s1807_s29, %s1803_s1  ;;  %p1811_p12 = scmp.lt.u32.totalorder %s1803_s1, %s2254_s24 }
 0x778   : > { %p1805_p7 = pnand %p1804_p4, %p2027_p5 }
 0x779   : > { %p1810_p11 = por %p1809_p10, %p1808_p9 }
 0x77a   : > { %p1806_p8 = pneg %p1805_p7 }
 0x77b   : > { %p1812_p13 = por %p1811_p12, %p1810_p11 }
 0x77d   : > { %p1813_p0 = pnand %p1812_p13, %p1806_p8 }
 0x77f   : > { %1816 = shalt.err (!%p1813_p0)
}
 0x780   : > { %1722 = dma.vmem_to_hbm [thread:$0]  (%p2027_p5), %s1401_s22, 128, %s2254_s24, %s1374_s19   ;;  %v1513_v42 = vld [vmem:[%s2347_s15] ss:$0 sm:$0xff] }
 0x781   : > { %v1514_v44 = vld [vmem:[%s2348_s16] ss:$0 sm:$0xff]  ;;  %s2375_s22 = sshll.u32 %s2224_s25, 3  ;;  %s2376_s26 = sshll.u32 %s2010_s0, 7 }
 0x782   : > { %s570_s19 = scalar_lea.vmem [#allocation2], %s2375_s22  ;;  %s2288_s3 = scalar_lea.hbm %s2349_s17, %s2376_s26 }
 0x783   : > { %s1387_s1 = sshll.u32 %s570_s19, 4  ;;  %s1369_s4 = scalar_lea.sflag [#allocation3], %s2224_s25  ;;  %s2290_s1 = int_to_ptr.vmem [resolvable:$true] %s1387_s1 }
 0x784   : > { %s1817_s23 = scalar_lea.vmem %s2290_s1, 128  ;;  %s1893_s20 = smov [#allocation2]  }
 0x785   : > { %p1818_p1 = scmp.ne.s32.totalorder %s2290_s1, %s1817_s23  ;;  %s1821_s0 = sshll.u32 %s1893_s20, 4  ;;  %s1822_s0 = int_to_ptr.vmem [resolvable:$false] %s1821_s0 }
 0x786   : > { %s1823_s24 = scalar_lea.vmem %s1822_s0, 256  ;;  %p1824_p4 = scmp.lt.s32.totalorder %s2290_s1, %s1822_s0 }
 0x787   : > { %p1819_p2 = pnand %p1818_p1, %p2027_p5  ;;  %p1825_p7 = scmp.lt.s32.totalorder %s1823_s24, %s1817_s23 }
 0x789   : > { %p1820_p3 = pneg %p1819_p2  ;;  %p1826_p8 = por %p1825_p7, %p1824_p4 }
 0x78b   : > { %p1827_p9 = pnand %p1826_p8, %p1820_p3 }
 0x7fc   : > { %v1339_v16 = vpop.xlane.xlu0 %1338 }
 0x7fd   : > { %v1340_v35 = vmul.f32 0.03125, %v1339_v16 }
 0x7ff   : > { %v1346_v37 = vmul.f32 %v1340_v35, %v1340_v35  ;;  %v1348_v40 = vsub.f32 %v1334_v31, %v1340_v35 }
 0x800   : > { %v1344_v36 = vpop.xlane.xlu0 %1343 }
 0x801   : > { %v1345_v38 = vmul.f32 0.03125, %v1344_v36 }
 0x803   : > { %v1347_v39 = vsub.f32 %v1345_v38, %v1346_v37 }
 0x805   : > { %v1349_v3 = vadd.f32 1e-05, %v1347_v39 }
 0x807   : > { %1787 = vrsqrt.f32 %v1349_v3 }
 0x811   : > { %v1788_v41 = vpop.eup %1787 }
 0x812   : > { %v1351_v43 = vmul.f32 %v1788_v41, %v1348_v40 }
 0x814   : > { %v1358_v45 = vmul.f32 %v1513_v42, %v1351_v43 }
 0x816   : > { %v1365_v46 = vadd.f32 %v1514_v44, %v1358_v45 }
 0x818   : > { %1366 = vst.msk [vmem:[%s570_s19] sm:$0xff] %vm583_vm1, %v1365_v46 }
 0x819   : > { %1830 = shalt.err (!%p1827_p9)
}
 0x81a   : > { %s1831_s25 = scalar_lea.hbm %s2288_s3, 128  ;;  %s1835_s26 = scalar_lea.hbm %s2349_s17, 256 }
 0x81b   : > { %p1832_p10 = scmp.ne.s32.totalorder %s2288_s3, %s1831_s25  ;;  %p1836_p13 = scmp.lt.u32.totalorder %s2288_s3, %s2349_s17 }
 0x81c   : > { %p1837_p0 = scmp.lt.u32.totalorder %s1835_s26, %s1831_s25  ;;  %p1839_p2 = scmp.lt.u32.totalorder %s1831_s25, %s2288_s3 }
 0x81d   : > { %p1833_p11 = pnand %p1832_p10, %p2027_p5 }
 0x81e   : > { %p1838_p1 = por %p1837_p0, %p1836_p13 }
 0x81f   : > { %p1834_p12 = pneg %p1833_p11 }
 0x820   : > { %p1840_p3 = por %p1839_p2, %p1838_p1 }
 0x822   : > { %p1841_p4 = pnand %p1840_p3, %p1834_p12 }
 0x824   : > { %1844 = shalt.err (!%p1841_p4)
}
 0x825   : > { %1721 = dma.vmem_to_hbm [thread:$0]  (%p2027_p5), %s2290_s1, 128, %s2288_s3, %s1369_s4  }
 0x826 PF: > { %p1732_p7 = scmp.ge.s32.totalorder %s1883_s30, 2  ;;  %s1412_s20 = sand.u32 1, %s1871_s27  }
 0x827   : > { %s1413_s0 = scalar_lea.sflag [#allocation3], %s1412_s20 }
 0x828   : > { %p1726_p8 = pnand %p1732_p7, %p2031_p6 }
 0x82a   : > { %1862 = dma.done.wait (!%p1726_p8), %s1413_s0, 128  }
 0x82b   : > { %1864 = vsyncadd (!%p1726_p8), %s1413_s0, 4294967168  ;;  %s1422_s24 = scalar_lea.sflag [#allocation5], %s1412_s20 }
 0x82c   : > { %1866 = dma.done.wait (!%p1726_p8), %s1422_s24, 128  }
 0x82d   : > { %1868 = vsyncadd (!%p1726_p8), %s1422_s24, 4294967168  ;;  %s2378_s30 = sld [smem:[#allocation9_spill]]  ;;  %s2379_s2 = sld [smem:[#allocation8_spill]] }
 0x82e   : > { %s2380_s29 = sld [smem:[#allocation10_spill]]  ;;  %s2381_s27 = smov %s1875_s28 }
 0x833   : > { %p32_p5 = scmp.ge.s32.totalorder %s2378_s30, 4   ;;  %s2382_s28 = smov %s2379_s2 }
 0x835   :  { %34 = sbr.rel (!%p32_p5) target bundleno = 11 (0xb), region = 140 }
 0x83c   :  { %1427 = vsyncpa [#allocation3], 1 }
 0x83d   :  { %1429 = vsyncpa [#allocation3 + $0x1], 1 }
 0x83e   :  { %1430 = vsyncpa [#allocation5], 1 }
 0x83f   :  { %1432 = vsyncpa [#allocation5 + $0x1], 1 }

</bundles_post_ra>
